<compile_context>
chip_gen: v7x
topology: tpu7x:2x2x1
jax: 0.10.0
libtpu: 0.0.40
codegen_flags: <defaults>
</compile_context>

<pallas_src>
import math

import jax
import jax.numpy as jnp
from jax.experimental import pallas as pl
from jax.experimental.pallas import tpu as pltpu

OUT_PAD = 128  # lane-dense padded width of the final layer / output


def _round_up(x: int, m: int) -> int:
    return (x + m - 1) // m * m


# ----------------------------------------------------------------------------
# Pallas kernel: fused 5-layer MLP + sigmoid + affine rescale (one batch tile)
# ----------------------------------------------------------------------------
def actor_mlp_kernel(
    x_ref,
    w0_ref, b0_ref,
    w1_ref, b1_ref,
    w2_ref, b2_ref,
    w3_ref, b3_ref,
    w4_ref, b4_ref,
    scale_ref, offset_ref,
    o_ref,
):
    cdt = w0_ref.dtype                       # MXU operand dtype (bf16 or f32)
    h = x_ref[...]
    if h.dtype != cdt:
        h = h.astype(cdt)

    # 4 hidden layers: MXU matmul with f32 accumulation + bias + ReLU.
    for w_ref, b_ref in ((w0_ref, b0_ref), (w1_ref, b1_ref),
                         (w2_ref, b2_ref), (w3_ref, b3_ref)):
        a = jnp.dot(h, w_ref[...], preferred_element_type=jnp.float32)
        a = a + b_ref[...]                   # bias kept f32
        h = jnp.maximum(a, 0.0).astype(cdt)

    # Final (lane-padded to 128) layer, sigmoid (EUP exp + approx recip), rescale.
    y = jnp.dot(h, w4_ref[...], preferred_element_type=jnp.float32) + b4_ref[...]
    sig = pl.reciprocal(1.0 + jnp.exp(-y), approx=True)
    o_ref[...] = sig * scale_ref[...] + offset_ref[...]


# ----------------------------------------------------------------------------
# Parameter construction (torch.nn.Linear default init: U(-1/sqrt(fan_in), ...))
# ----------------------------------------------------------------------------
def init_linear(key, fan_in, fan_out):
    kw, kb = jax.random.split(key)
    bound = 1.0 / math.sqrt(fan_in)
    w = jax.random.uniform(kw, (fan_in, fan_out), minval=-bound, maxval=bound,
                           dtype=jnp.float32)
    b = jax.random.uniform(kb, (1, fan_out), minval=-bound, maxval=bound,
                           dtype=jnp.float32)
    return w, b


class ActorBaseModelPallas:
    """JAX/Pallas port of the PyTorch ActorBaseModel."""

    def __init__(self, num_turns: int, board_width: float, max_magnitude: float,
                 key: jax.Array, *, param_dtype=jnp.bfloat16, batch_tile: int = 512):
        self.num_turns = num_turns
        self.board_width = float(board_width)
        self.max_magnitude = float(max_magnitude)
        self.state_length = num_turns * 4 + 3
        self.action_length = 3
        self.param_dtype = param_dtype       # use jnp.float32 on v5e
        self.batch_tile = int(batch_tile)    # 512 for v6e/v7x, 128-256 for v5e

        dims = [self.state_length, 512, 256, 128, 64, self.action_length]
        keys = jax.random.split(key, len(dims) - 1)
        # f32 master copies (also used by the pure-JAX reference).
        self.params_f32 = [init_linear(keys[i], dims[i], dims[i + 1])
                           for i in range(len(dims) - 1)]

        # position in [0, board_width], angle in [0, pi], magnitude in [0, max_mag]
        self.scale_vec = jnp.array(
            [[self.board_width, math.pi, self.max_magnitude]], dtype=jnp.float32)
        self.offset_vec = jnp.zeros((1, self.action_length), dtype=jnp.float32)

        # Kernel-side copies: weights in param_dtype (MXU operands), biases f32,
        # final layer / scale / offset lane-padded to OUT_PAD (padded cols are 0
        # weight / 0 bias / 0 scale, so they contribute nothing and are sliced off).
        flat = []
        last = len(self.params_f32) - 1
        for i, (w, b) in enumerate(self.params_f32):
            if i == last:
                w = jnp.pad(w, ((0, 0), (0, OUT_PAD - w.shape[1])))
                b = jnp.pad(b, ((0, 0), (0, OUT_PAD - b.shape[1])))
            flat.append(w.astype(param_dtype))
            flat.append(b.astype(jnp.float32))
        self._flat_params = flat
        self._scale_pad = jnp.pad(self.scale_vec,
                                  ((0, 0), (0, OUT_PAD - self.action_length)))
        self._offset_pad = jnp.pad(self.offset_vec,
                                   ((0, 0), (0, OUT_PAD - self.action_length)))

    def __call__(self, state: jnp.ndarray) -> jnp.ndarray:
        assert state.ndim == 2, "ActorBaseModel forward must receive batch"
        assert state.shape[1] == self.state_length, "Invalid state length"
        batch = state.shape[0]

        tb = min(self.batch_tile, _round_up(batch, 8))
        padded = _round_up(batch, tb)

        x = state.astype(jnp.float32)
        if padded != batch:
            x = jnp.pad(x, ((0, padded - batch), (0, 0)))

        const = lambda i: (0, 0)   # weights DMA'd once, VMEM-resident across grid
        in_specs = [pl.BlockSpec((tb, self.state_length), lambda i: (i, 0))]
        for p in self._flat_params:
            in_specs.append(pl.BlockSpec(p.shape, const))
        in_specs += [pl.BlockSpec((1, OUT_PAD), const)] * 2   # scale, offset

        grid_spec = pltpu.PrefetchScalarGridSpec(
            num_scalar_prefetch=0,
            grid=(padded // tb,),
            in_specs=in_specs,
            out_specs=pl.BlockSpec((tb, OUT_PAD), lambda i: (i, 0)),
        )

        out = pl.pallas_call(
            actor_mlp_kernel,
            out_shape=jax.ShapeDtypeStruct((padded, OUT_PAD), jnp.float32),
            grid_spec=grid_spec,
            compiler_params=pltpu.CompilerParams(
                dimension_semantics=("parallel",),   # megacore sharding on v7x
            ),
        )(x, *self._flat_params, self._scale_pad, self._offset_pad)

        return out[:batch, :self.action_length]


# ----------------------------------------------------------------------------
# Pure-JAX f32 reference for correctness checking
# ----------------------------------------------------------------------------
def reference_forward(model: ActorBaseModelPallas, state: jnp.ndarray) -> jnp.ndarray:
    x = state.astype(jnp.float32)
    n = len(model.params_f32)
    for i, (w, b) in enumerate(model.params_f32):
        x = x @ w + b
        if i < n - 1:
            x = jnp.maximum(x, 0.0)
    x = jax.nn.sigmoid(x)
    return x * model.scale_vec + model.offset_vec


if __name__ == "__main__":
    key = jax.random.PRNGKey(0)
    k_params, k_state = jax.random.split(key)

    num_turns = 2          # state_length = 2*4 + 3 = 11
    board_width = 10.0
    max_magnitude = 5.0
    batch = 300            # non-multiple of the tile -> exercises padding + 3-step grid

    model = ActorBaseModelPallas(num_turns, board_width, max_magnitude, k_params,
                                 param_dtype=jnp.bfloat16, batch_tile=128)

    state = jax.random.normal(k_state, (batch, model.state_length), dtype=jnp.float32)

    out = jax.block_until_ready(model(state))
    ref = reference_forward(model, state)

    assert out.shape == (batch, model.action_length)
    assert bool(jnp.all(jnp.isfinite(out)))
    # bf16 weights/activations + approx-reciprocal sigmoid vs. pure-f32 reference:
    # tolerance loosened accordingly (outputs are O(1)-O(10)).
    assert jnp.allclose(out, ref, atol=5e-2, rtol=5e-2), "mismatch vs reference"

    print("KERNEL_OK")
</pallas_src>

<mosaic_0001>
module attributes {stable_mosaic.version = 11 : i64} {
  func.func @actor_mlp_kernel(%arg0: i32, %arg1: memref<128x11xf32, #tpu.memory_space<vmem>>, %arg2: memref<11x512xbf16, #tpu.memory_space<vmem>>, %arg3: memref<1x512xf32, #tpu.memory_space<vmem>>, %arg4: memref<512x256xbf16, #tpu.memory_space<vmem>>, %arg5: memref<1x256xf32, #tpu.memory_space<vmem>>, %arg6: memref<256x128xbf16, #tpu.memory_space<vmem>>, %arg7: memref<1x128xf32, #tpu.memory_space<vmem>>, %arg8: memref<128x64xbf16, #tpu.memory_space<vmem>>, %arg9: memref<1x64xf32, #tpu.memory_space<vmem>>, %arg10: memref<64x128xbf16, #tpu.memory_space<vmem>>, %arg11: memref<1x128xf32, #tpu.memory_space<vmem>>, %arg12: memref<1x128xf32, #tpu.memory_space<vmem>>, %arg13: memref<1x128xf32, #tpu.memory_space<vmem>>, %arg14: memref<128x128xf32, #tpu.memory_space<vmem>>) attributes {dimension_semantics = [#tpu.dimension_semantics<parallel>], iteration_bounds = array<i64: 3>, scalar_prefetch = 0 : i64, scratch_operands = 0 : i64, tpu.core_type = #tpu.core_type<tc>, window_params = [{transform_indices = @transform_0, window_bounds = array<i64: 128, 11>}, {pipeline_mode = #tpu.pipeline_mode<synchronous>, transform_indices = @transform_1, window_bounds = array<i64: 11, 512>}, {pipeline_mode = #tpu.pipeline_mode<synchronous>, transform_indices = @transform_2, window_bounds = array<i64: 1, 512>}, {pipeline_mode = #tpu.pipeline_mode<synchronous>, transform_indices = @transform_3, window_bounds = array<i64: 512, 256>}, {pipeline_mode = #tpu.pipeline_mode<synchronous>, transform_indices = @transform_4, window_bounds = array<i64: 1, 256>}, {pipeline_mode = #tpu.pipeline_mode<synchronous>, transform_indices = @transform_5, window_bounds = array<i64: 256, 128>}, {pipeline_mode = #tpu.pipeline_mode<synchronous>, transform_indices = @transform_6, window_bounds = array<i64: 1, 128>}, {pipeline_mode = #tpu.pipeline_mode<synchronous>, transform_indices = @transform_7, window_bounds = array<i64: 128, 64>}, {pipeline_mode = #tpu.pipeline_mode<synchronous>, transform_indices = @transform_8, window_bounds = array<i64: 1, 64>}, {pipeline_mode = #tpu.pipeline_mode<synchronous>, transform_indices = @transform_9, window_bounds = array<i64: 64, 128>}, {pipeline_mode = #tpu.pipeline_mode<synchronous>, transform_indices = @transform_10, window_bounds = array<i64: 1, 128>}, {pipeline_mode = #tpu.pipeline_mode<synchronous>, transform_indices = @transform_11, window_bounds = array<i64: 1, 128>}, {pipeline_mode = #tpu.pipeline_mode<synchronous>, transform_indices = @transform_12, window_bounds = array<i64: 1, 128>}, {transform_indices = @transform_13, window_bounds = array<i64: 128, 128>}]} {
    %c0 = arith.constant 0 : index
    %c0_0 = arith.constant 0 : index
    %0 = vector.load %arg1[%c0, %c0_0] : memref<128x11xf32, #tpu.memory_space<vmem>>, vector<128x11xf32>
    %1 = arith.truncf %0 : vector<128x11xf32> to vector<128x11xbf16>
    %c0_1 = arith.constant 0 : index
    %c0_2 = arith.constant 0 : index
    %2 = vector.load %arg2[%c0_1, %c0_2] : memref<11x512xbf16, #tpu.memory_space<vmem>>, vector<11x512xbf16>
    %cst = arith.constant dense<0.000000e+00> : vector<128x512xf32>
    %3 = tpu.matmul %1, %2, %cst {dimension_numbers = #tpu.dot_dimension_numbers<[1], [0], [0], [1], [0, 0, 1, 1], [], []>} : vector<128x11xbf16>, vector<11x512xbf16>, vector<128x512xf32> -> vector<128x512xf32>
    %c0_3 = arith.constant 0 : index
    %c0_4 = arith.constant 0 : index
    %4 = vector.load %arg3[%c0_3, %c0_4] : memref<1x512xf32, #tpu.memory_space<vmem>>, vector<1x512xf32>
    %5 = vector.broadcast %4 : vector<1x512xf32> to vector<128x512xf32>
    %6 = arith.addf %3, %5 : vector<128x512xf32>
    %cst_5 = arith.constant 0.000000e+00 : f32
    %7 = vector.broadcast %cst_5 : f32 to vector<128x512xf32>
    %8 = arith.maximumf %6, %7 : vector<128x512xf32>
    %9 = arith.truncf %8 : vector<128x512xf32> to vector<128x512xbf16>
    %c0_6 = arith.constant 0 : index
    %c0_7 = arith.constant 0 : index
    %10 = vector.load %arg4[%c0_6, %c0_7] : memref<512x256xbf16, #tpu.memory_space<vmem>>, vector<512x256xbf16>
    %cst_8 = arith.constant dense<0.000000e+00> : vector<128x256xf32>
    %11 = tpu.matmul %9, %10, %cst_8 {dimension_numbers = #tpu.dot_dimension_numbers<[1], [0], [0], [1], [0, 0, 1, 1], [], []>} : vector<128x512xbf16>, vector<512x256xbf16>, vector<128x256xf32> -> vector<128x256xf32>
    %c0_9 = arith.constant 0 : index
    %c0_10 = arith.constant 0 : index
    %12 = vector.load %arg5[%c0_9, %c0_10] : memref<1x256xf32, #tpu.memory_space<vmem>>, vector<1x256xf32>
    %13 = vector.broadcast %12 : vector<1x256xf32> to vector<128x256xf32>
    %14 = arith.addf %11, %13 : vector<128x256xf32>
    %cst_11 = arith.constant 0.000000e+00 : f32
    %15 = vector.broadcast %cst_11 : f32 to vector<128x256xf32>
    %16 = arith.maximumf %14, %15 : vector<128x256xf32>
    %17 = arith.truncf %16 : vector<128x256xf32> to vector<128x256xbf16>
    %c0_12 = arith.constant 0 : index
    %c0_13 = arith.constant 0 : index
    %18 = vector.load %arg6[%c0_12, %c0_13] : memref<256x128xbf16, #tpu.memory_space<vmem>>, vector<256x128xbf16>
    %cst_14 = arith.constant dense<0.000000e+00> : vector<128x128xf32>
    %19 = tpu.matmul %17, %18, %cst_14 {dimension_numbers = #tpu.dot_dimension_numbers<[1], [0], [0], [1], [0, 0, 1, 1], [], []>} : vector<128x256xbf16>, vector<256x128xbf16>, vector<128x128xf32> -> vector<128x128xf32>
    %c0_15 = arith.constant 0 : index
    %c0_16 = arith.constant 0 : index
    %20 = vector.load %arg7[%c0_15, %c0_16] : memref<1x128xf32, #tpu.memory_space<vmem>>, vector<1x128xf32>
    %21 = vector.broadcast %20 : vector<1x128xf32> to vector<128x128xf32>
    %22 = arith.addf %19, %21 : vector<128x128xf32>
    %cst_17 = arith.constant 0.000000e+00 : f32
    %23 = vector.broadcast %cst_17 : f32 to vector<128x128xf32>
    %24 = arith.maximumf %22, %23 : vector<128x128xf32>
    %25 = arith.truncf %24 : vector<128x128xf32> to vector<128x128xbf16>
    %c0_18 = arith.constant 0 : index
    %c0_19 = arith.constant 0 : index
    %26 = vector.load %arg8[%c0_18, %c0_19] : memref<128x64xbf16, #tpu.memory_space<vmem>>, vector<128x64xbf16>
    %cst_20 = arith.constant dense<0.000000e+00> : vector<128x64xf32>
    %27 = tpu.matmul %25, %26, %cst_20 {dimension_numbers = #tpu.dot_dimension_numbers<[1], [0], [0], [1], [0, 0, 1, 1], [], []>} : vector<128x128xbf16>, vector<128x64xbf16>, vector<128x64xf32> -> vector<128x64xf32>
    %c0_21 = arith.constant 0 : index
    %c0_22 = arith.constant 0 : index
    %28 = vector.load %arg9[%c0_21, %c0_22] : memref<1x64xf32, #tpu.memory_space<vmem>>, vector<1x64xf32>
    %29 = vector.broadcast %28 : vector<1x64xf32> to vector<128x64xf32>
    %30 = arith.addf %27, %29 : vector<128x64xf32>
    %cst_23 = arith.constant 0.000000e+00 : f32
    %31 = vector.broadcast %cst_23 : f32 to vector<128x64xf32>
    %32 = arith.maximumf %30, %31 : vector<128x64xf32>
    %33 = arith.truncf %32 : vector<128x64xf32> to vector<128x64xbf16>
    %c0_24 = arith.constant 0 : index
    %c0_25 = arith.constant 0 : index
    %34 = vector.load %arg10[%c0_24, %c0_25] : memref<64x128xbf16, #tpu.memory_space<vmem>>, vector<64x128xbf16>
    %cst_26 = arith.constant dense<0.000000e+00> : vector<128x128xf32>
    %35 = tpu.matmul %33, %34, %cst_26 {dimension_numbers = #tpu.dot_dimension_numbers<[1], [0], [0], [1], [0, 0, 1, 1], [], []>} : vector<128x64xbf16>, vector<64x128xbf16>, vector<128x128xf32> -> vector<128x128xf32>
    %c0_27 = arith.constant 0 : index
    %c0_28 = arith.constant 0 : index
    %36 = vector.load %arg11[%c0_27, %c0_28] : memref<1x128xf32, #tpu.memory_space<vmem>>, vector<1x128xf32>
    %37 = vector.broadcast %36 : vector<1x128xf32> to vector<128x128xf32>
    %38 = arith.addf %35, %37 : vector<128x128xf32>
    %cst_29 = arith.constant 0.000000e+00 : f32
    %39 = vector.broadcast %cst_29 : f32 to vector<128x128xf32>
    %40 = arith.subf %39, %38 : vector<128x128xf32>
    %41 = math.exp %40 : vector<128x128xf32>
    %cst_30 = arith.constant 1.000000e+00 : f32
    %42 = vector.broadcast %cst_30 : f32 to vector<128x128xf32>
    %43 = arith.addf %42, %41 : vector<128x128xf32>
    %44 = tpu.reciprocal %43 {approx = true} : vector<128x128xf32> -> vector<128x128xf32>
    %c0_31 = arith.constant 0 : index
    %c0_32 = arith.constant 0 : index
    %45 = vector.load %arg12[%c0_31, %c0_32] : memref<1x128xf32, #tpu.memory_space<vmem>>, vector<1x128xf32>
    %46 = vector.broadcast %45 : vector<1x128xf32> to vector<128x128xf32>
    %47 = arith.mulf %44, %46 : vector<128x128xf32>
    %c0_33 = arith.constant 0 : index
    %c0_34 = arith.constant 0 : index
    %48 = vector.load %arg13[%c0_33, %c0_34] : memref<1x128xf32, #tpu.memory_space<vmem>>, vector<1x128xf32>
    %49 = vector.broadcast %48 : vector<1x128xf32> to vector<128x128xf32>
    %50 = arith.addf %47, %49 : vector<128x128xf32>
    %c0_35 = arith.constant 0 : index
    %c0_36 = arith.constant 0 : index
    %51 = vector.load %arg14[%c0_35, %c0_36] : memref<128x128xf32, #tpu.memory_space<vmem>>, vector<128x128xf32>
    tpu.vector_store %arg14[%c0_35, %c0_36], %50 {strides = array<i32>} : memref<128x128xf32, #tpu.memory_space<vmem>>, vector<128x128xf32>,
    return
  }
  func.func @transform_0(%arg0: i32) -> (i32, i32) {
    %c0_i32 = arith.constant 0 : i32
    %c0_i32_0 = arith.constant 0 : i32
    return %arg0, %c0_i32 : i32, i32
  }
  func.func @transform_1(%arg0: i32) -> (i32, i32) {
    %c0_i32 = arith.constant 0 : i32
    %c0_i32_0 = arith.constant 0 : i32
    %c0_i32_1 = arith.constant 0 : i32
    return %c0_i32, %c0_i32_0 : i32, i32
  }
  func.func @transform_2(%arg0: i32) -> (i32, i32) {
    %c0_i32 = arith.constant 0 : i32
    %c0_i32_0 = arith.constant 0 : i32
    %c0_i32_1 = arith.constant 0 : i32
    return %c0_i32, %c0_i32_0 : i32, i32
  }
  func.func @transform_3(%arg0: i32) -> (i32, i32) {
    %c0_i32 = arith.constant 0 : i32
    %c0_i32_0 = arith.constant 0 : i32
    %c0_i32_1 = arith.constant 0 : i32
    return %c0_i32, %c0_i32_0 : i32, i32
  }
  func.func @transform_4(%arg0: i32) -> (i32, i32) {
    %c0_i32 = arith.constant 0 : i32
    %c0_i32_0 = arith.constant 0 : i32
    %c0_i32_1 = arith.constant 0 : i32
    return %c0_i32, %c0_i32_0 : i32, i32
  }
  func.func @transform_5(%arg0: i32) -> (i32, i32) {
    %c0_i32 = arith.constant 0 : i32
    %c0_i32_0 = arith.constant 0 : i32
    %c0_i32_1 = arith.constant 0 : i32
    return %c0_i32, %c0_i32_0 : i32, i32
  }
  func.func @transform_6(%arg0: i32) -> (i32, i32) {
    %c0_i32 = arith.constant 0 : i32
    %c0_i32_0 = arith.constant 0 : i32
    %c0_i32_1 = arith.constant 0 : i32
    return %c0_i32, %c0_i32_0 : i32, i32
  }
  func.func @transform_7(%arg0: i32) -> (i32, i32) {
    %c0_i32 = arith.constant 0 : i32
    %c0_i32_0 = arith.constant 0 : i32
    %c0_i32_1 = arith.constant 0 : i32
    return %c0_i32, %c0_i32_0 : i32, i32
  }
  func.func @transform_8(%arg0: i32) -> (i32, i32) {
    %c0_i32 = arith.constant 0 : i32
    %c0_i32_0 = arith.constant 0 : i32
    %c0_i32_1 = arith.constant 0 : i32
    return %c0_i32, %c0_i32_0 : i32, i32
  }
  func.func @transform_9(%arg0: i32) -> (i32, i32) {
    %c0_i32 = arith.constant 0 : i32
    %c0_i32_0 = arith.constant 0 : i32
    %c0_i32_1 = arith.constant 0 : i32
    return %c0_i32, %c0_i32_0 : i32, i32
  }
  func.func @transform_10(%arg0: i32) -> (i32, i32) {
    %c0_i32 = arith.constant 0 : i32
    %c0_i32_0 = arith.constant 0 : i32
    %c0_i32_1 = arith.constant 0 : i32
    return %c0_i32, %c0_i32_0 : i32, i32
  }
  func.func @transform_11(%arg0: i32) -> (i32, i32) {
    %c0_i32 = arith.constant 0 : i32
    %c0_i32_0 = arith.constant 0 : i32
    %c0_i32_1 = arith.constant 0 : i32
    return %c0_i32, %c0_i32_0 : i32, i32
  }
  func.func @transform_12(%arg0: i32) -> (i32, i32) {
    %c0_i32 = arith.constant 0 : i32
    %c0_i32_0 = arith.constant 0 : i32
    %c0_i32_1 = arith.constant 0 : i32
    return %c0_i32, %c0_i32_0 : i32, i32
  }
  func.func @transform_13(%arg0: i32) -> (i32, i32) {
    %c0_i32 = arith.constant 0 : i32
    %c0_i32_0 = arith.constant 0 : i32
    return %arg0, %c0_i32 : i32, i32
  }
}

</mosaic_0001>

<bundles_post_ra>
// kernel: tpu_custom_call.1
= control target key start
LH: loop header
LB: loop body
LE: loop exit
PB: predicated region body
PF: predicated region fallthrough
CT: control target
= control target key end

     0   :  { %s4057_s0 = inlined_call_operand.vmem [shape: f32[384,11], index: 0, kind: input, shape index: {}]   ;;  %s4058_s1 = inlined_call_operand.hbm [shape: bf16[11,512], index: 1, kind: input, shape index: {}]   ;;  %s4059_s2 = inlined_call_operand.vmem [shape: f32[1,512], index: 2, kind: input, shape index: {}]   ;;  %s4060_s3 = inlined_call_operand.vmem [shape: bf16[512,256], index: 3, kind: input, shape index: {}]   ;;  %s4061_s4 = inlined_call_operand.vmem [shape: f32[1,256], index: 4, kind: input, shape index: {}]   ;;  %s4062_s5 = inlined_call_operand.hbm [shape: bf16[256,128], index: 5, kind: input, shape index: {}]   ;;  %s4063_s6 = inlined_call_operand.hbm [shape: f32[1,128], index: 6, kind: input, shape index: {}]   ;;  %s4064_s7 = inlined_call_operand.vmem [shape: bf16[128,64], index: 7, kind: input, shape index: {}]   ;;  %s4065_s8 = inlined_call_operand.vmem [shape: f32[1,64], index: 8, kind: input, shape index: {}]   ;;  %s4066_s9 = inlined_call_operand.vmem [shape: bf16[64,128], index: 9, kind: input, shape index: {}]   ;;  %s4067_s10 = inlined_call_operand.vmem [shape: f32[1,128], index: 10, kind: input, shape index: {}]   ;;  %s4068_s11 = inlined_call_operand.vmem [shape: f32[1,128], index: 11, kind: input, shape index: {}]   ;;  %s4069_s12 = inlined_call_operand.vmem [shape: f32[1,128], index: 12, kind: input, shape index: {}]   ;;  %s4070_s13 = inlined_call_operand.hbm [shape: f32[384,128], index: 13, kind: output, shape index: {}]  }
   0x1   :  { %4083 = sst [smem:[#allocation19_spill]] %s4062_s5 }
   0x2   :  { %4084 = sst [smem:[#allocation20_spill]] %s4070_s13 }
   0x3   :  { %18 = vsyncpa [#allocation3], 0 }
   0x4   :  { %19 = vsyncpa [#allocation6], 0 }
   0x5   :  { %20 = vsyncpa [#allocation4], 0 }
   0x6   :  { %22 = vsyncpa [#allocation4 + $0x1], 0  ;;  %s3308_s25 = smov 0   ;;  %s3310_s26 = smov 0  }
   0x7   :  { %s3312_s27 = smov 0   ;;  %s3314_s28 = smov 0  }
   0x8 LB: > { %4085 = sst [smem:[#allocation12_spill]] %s3212_s25  ;;  %s3329_s29 = sadd.s32 4294967295, %s3224_s28   ;;  %s3224_s28 = sphi %s3314_s28, %s4110_s28   ;;  %s3220_s27 = sphi %s3312_s27, %s4112_s27   ;;  %s3216_s26 = sphi %s3310_s26, %s4114_s26   ;;  %s3212_s25 = sphi %s3308_s25, %s4113_s25  }
   0x9   : > { %4086 = sst [smem:[#allocation13_spill]] %s3220_s27  ;;  %s2442_s30 = sadd.s32 4294967294, %s3224_s28  }
   0xa   : > { %4087 = sst [smem:[#allocation14_spill]] %s3224_s28  ;;  %s3333_s14 = sadd.s32 1, %s3224_s28  }
   0xb   : > { %4088 = sst [smem:[#allocation15_spill]] %s3333_s14  ;;  %s313_s15 = sadd.s32 1, %s3220_s27 }
   0xc   : > { %s310_s16 = ssub.s32 %s3224_s28, %s3333_s14  ;;  %p323_p0 = scmp.ne.s32.totalorder %s3220_s27, %s3216_s26 }
   0xd   : > { %p311_p1 = scmp.eq.s32.totalorder %s310_s16, 0  ;;  %p324_p2 = scmp.eq.s32.totalorder %s3329_s29, 2 }
   0xe   : > { %p329_p3 = scmp.ne.s32.totalorder %s3216_s26, %s3212_s25  ;;  %p330_p4 = scmp.eq.s32.totalorder %s2442_s30, 2 }
   0xf   : > { %s3344_s17 = scalar_select %p311_p1, %s3220_s27, %s313_s15  }
  0x10   : > { %p3346_p5 = por %p324_p2, %p323_p0  ;;  %p3350_p6 = por %p330_p4, %p329_p3 }
  0x11   : > { %4089 = sst [smem:[#allocation16_spill]] %s3344_s17  ;;  %p2443_p7 = scmp.ge.s32.totalorder %s3224_s28, 1 }
  0x12   : > { %s4090_s18 = scalar_select %p3346_p5, 1, 0 }
  0x13   : > { %s4092_s19 = scalar_select %p3350_p6, 1, 0 }
  0x14   : > { %4091 = sst [smem:[#allocation17_spill]] %s4090_s18  ;;  %p337_p8 = scmp.lt.s32.totalorder %s3224_s28, 4 }
  0x15   : > { %4093 = sst [smem:[#allocation18_spill]] %s4092_s19  ;;  %p4075_p9 = scmp.eq.s32.totalorder %s3329_s29, 0 }
  0x16   : > { %p3357_p10 = pnand %p2443_p7, %p337_p8  ;;  %s3226_s21 = smov [#allocation5]  }
  0x17   : > { %s371_s22 = sshll.u32 %s3226_s21, 4  ;;  %s3227_s24 = smov [#allocation2]   ;;  %s372_s22 = int_to_ptr.vmem [resolvable:$true] %s371_s22 }
  0x18   : > { %s4094_s20 = scalar_select %p3357_p10, 1, 0 }
  0x19   : > { %p2812_p11 = pneg %p3357_p10  ;;  %s349_s30 = sshll.u32 %s3227_s24, 4  ;;  %s3369_s30 = int_to_ptr.vmem [resolvable:$true] %s349_s30 }
  0x1a   : > { %s4096_s5 = sld [smem:[#allocation19_spill]] }
  0x1b   : > { %p3365_p12 = pnand %p4075_p9, %p2812_p11 }
  0x1d   : > { %p3379_p0 = pneg %p3365_p12 }
  0x20   : > { %s3070_s17 = scalar_lea.hbm %s4096_s5, 2048 }
  0x21   : > { %p3071_p13 = scmp.ne.s32.totalorder %s4096_s5, %s3070_s17  ;;  %p3077_p3 = scmp.lt.u32.totalorder %s3070_s17, %s4096_s5 }
  0x23   : > { %p3073_p1 = pnand %p3379_p0, %p3071_p13 }
  0x25   : > { %p3074_p2 = pneg %p3073_p1 }
  0x27   : > { %p3079_p4 = pnand %p3077_p3, %p3074_p2 }
  0x29   : > { %3082 = shalt.err (!%p3079_p4)
}
  0x2a   : > { %s3083_s15 = scalar_lea.vmem %s372_s22, 2048  ;;  %p3091_p9 = scmp.lt.s32.totalorder %s372_s22, %s372_s22 }
  0x2b   : > { %p3084_p7 = scmp.ne.s32.totalorder %s372_s22, %s3083_s15  ;;  %p3092_p6 = scmp.lt.s32.totalorder %s3083_s15, %s3083_s15 }
  0x2d   : > { %p3086_p8 = pnand %p3084_p7, %p3379_p0  ;;  %p3093_p5 = por %p3092_p6, %p3091_p9 }
  0x2f   : > { %p3087_p11 = pneg %p3086_p8 }
  0x31   : > { %p3094_p10 = pnand %p3093_p5, %p3087_p11 }
  0x33   : > { %3097 = shalt.err (!%p3094_p10)
}
  0x34   : > { %s3228_s27 = smov 64   ;;  %s3229_s14 = smov 4  }
  0x35   : > { %2818 = dma.hbm_to_vmem [thread:$0]  (!%p3365_p12), %s4096_s5, 2048, %s372_s22, [#allocation6], %s3228_s27, %s3228_s27, %s3229_s14  }
  0x36   : > { %s3098_s25 = scalar_lea.hbm %s4058_s1, 512 }
  0x37   : > { %p3099_p13 = scmp.ne.s32.totalorder %s4058_s1, %s3098_s25  ;;  %p3105_p9 = scmp.lt.u32.totalorder %s3098_s25, %s4058_s1 }
  0x39   : > { %p3101_p5 = pnand %p3099_p13, %p3379_p0 }
  0x3b   : > { %p3102_p6 = pneg %p3101_p5 }
  0x3d   : > { %p3107_p10 = pnand %p3105_p9, %p3102_p6 }
  0x3f   : > { %3110 = shalt.err (!%p3107_p10)
}
  0x40   : > { %s3111_s22 = scalar_lea.vmem %s3369_s30, 512  ;;  %p3119_p4 = scmp.lt.s32.totalorder %s3369_s30, %s3369_s30 }
  0x41   : > { %p3112_p1 = scmp.ne.s32.totalorder %s3369_s30, %s3111_s22  ;;  %p3120_p7 = scmp.lt.s32.totalorder %s3111_s22, %s3111_s22 }
  0x43   : > { %p3114_p2 = pnand %p3112_p1, %p3379_p0  ;;  %p3121_p8 = por %p3120_p7, %p3119_p4 }
  0x45   : > { %p3115_p3 = pneg %p3114_p2 }
  0x47   : > { %p3122_p11 = pnand %p3121_p8, %p3115_p3 }
  0x49   : > { %3125 = shalt.err (!%p3122_p11)
}
  0x4a   : > { %s3230_s13 = smov 256   ;;  %s3231_s25 = smov 16  }
  0x4b   : > { %2815 = dma.hbm_to_vmem [thread:$0]  (!%p3365_p12), %s4058_s1, 512, %s3369_s30, [#allocation3], %s3230_s13, %s3230_s13, %s3231_s25  }
  0x4c   : > { %s3232_s27 = smov [#allocation7]   ;;  %s3126_s16 = scalar_lea.hbm %s4063_s6, 16 }
  0x4d   : > { %s385_s14 = sshll.u32 %s3232_s27, 4  ;;  %p3127_p13 = scmp.ne.s32.totalorder %s4063_s6, %s3126_s16  ;;  %s386_s14 = int_to_ptr.vmem [resolvable:$true] %s385_s14 }
  0x4e   : > { %p3133_p9 = scmp.lt.u32.totalorder %s3126_s16, %s4063_s6 }
  0x4f   : > { %p3129_p5 = pnand %p3127_p13, %p3379_p0 }
  0x51   : > { %p3130_p6 = pneg %p3129_p5 }
  0x53   : > { %p3135_p10 = pnand %p3133_p9, %p3130_p6 }
  0x55   : > { %3138 = shalt.err (!%p3135_p10)
}
  0x56   : > { %s3139_s30 = scalar_lea.vmem %s386_s14, 16  ;;  %s3146_s13 = scalar_lea.vmem %s386_s14, 32 }
  0x57   : > { %p3140_p1 = scmp.ne.s32.totalorder %s386_s14, %s3139_s30  ;;  %p3147_p4 = scmp.lt.s32.totalorder %s386_s14, %s386_s14 }
  0x58   : > { %p3148_p7 = scmp.lt.s32.totalorder %s3146_s13, %s3139_s30 }
  0x59   : > { %p3142_p2 = pnand %p3140_p1, %p3379_p0 }
  0x5a   : > { %p3149_p8 = por %p3148_p7, %p3147_p4 }
  0x5b   : > { %p3143_p3 = pneg %p3142_p2 }
  0x5d   : > { %p3150_p11 = pnand %p3149_p8, %p3143_p3 }
  0x5f   : > { %3153 = shalt.err (!%p3150_p11)
}
  0x60   : > { %2821 = dma.hbm_to_vmem [thread:$0]  (!%p3365_p12), %s4063_s6, 16, %s386_s14, [#allocation6]  }
  0x61   : > { %p4098_p13 = scmp.ne.s32.totalorder %s4094_s20, 0 }
  0x62   : > { %p4099_p5 = scmp.eq.s32.totalorder (!%p4098_p13), %s3329_s29, 0 }
  0x63   : > { %425 = sbr.rel (%p4098_p13) target bundleno = 1397 (0x575), region = 72 }
  0x6a   : > { %3199 = dma.done.wait (%p4099_p5), [#allocation3], 512   ;;  %p4100_p0 = pmov %p4099_p5 }
  0x6c   : > { %3201 = vsyncadd (%p4100_p0), [#allocation3], 4294966784  ;;  %p4101_p6 = pmov %p4100_p0 }
  0x6d   : > { %p4102_p9 = pmov %p4100_p0 }
  0x6e   : > { %3203 = dma.done.wait (%p4101_p6), [#allocation6], 2064  }
  0x6f   : > { %3205 = vsyncadd (%p4102_p9), [#allocation6], 4294965232  ;;  %vm576_vm0 = vcmask 1044480   ;;  %v3233_v0 = vmov 0   ;;  %s2453_s5 = sshll.u32 %s3329_s29, 4  ;;  %vm577_vm1 = vcmask 1045504  }
  0x70   : > { %624 = vmatprep.mubr.bf16.mxu0 %v3233_v0  ;;  %737 = vmatprep.mubr.bf16.mxu1 %v3233_v0  ;;  %p478_p12 = scmp.lt.s32.totalorder %s2453_s5, 47  ;;  %v3234_v1 = vmov 65535   ;;  %v2876_v4 = vld [vmem:[#allocation2 + $0x4] ss:$16 sps:$4 sm:$0x3f]   ;;  %vm551_vm2 = vcmask 89088  }
  0x71   : > { %v578_v2 = vsel %vm576_vm0, 4294967295, %v3234_v1  ;;  %v2878_v5 = vld [vmem:[#allocation2] ss:$16 sps:$4 sm:$0x3f]   ;;  %v2884_v17 = vld [vmem:[%s4060_s3 + $0x4] ss:$8 sps:$4 sm:$0xff]  }
  0x72   : > { %s4116_s5 = smov (!%p478_p12, %s2453_s5), 47  ;;  %v579_v3 = vsel %vm577_vm1, %v578_v2, 0  ;;  %v2879_v13 = vld [vmem:[#allocation2 + $0xc] ss:$16 sps:$4 sm:$0x3f]   ;;  %vm2071_vm3 = vcmask 523264  }
  0x73   : > { %s2454_s20 = sshll.u32 %s4116_s5, 3  ;;  %v584_v8 = vand.u32 %v2876_v4, %v579_v3  ;;  %v581_v9 = vand.u32 %v2878_v5, %v579_v3  ;;  %v2881_v14 = vld [vmem:[#allocation2 + $0x8] ss:$16 sps:$4 sm:$0x3f]   ;;  %v590_v16 = vand.u32 %v2879_v13, %v579_v3  ;;  %v2887_v19 = vld [vmem:[%s4060_s3 + $0x14] ss:$8 sps:$4 sm:$0xff]   ;;  %v515_v5 = vlaneseq }
  0x74   : > { %s3452_s18 = scalar_lea.vmem %s4057_s0, %s2454_s20  ;;  %v2882_v15 = vld [vmem:[%s4060_s3] ss:$8 sps:$4 sm:$0xff]   ;;  %v587_v18 = vand.u32 %v2881_v14, %v579_v3  ;;  %v2885_v21 = vld [vmem:[%s4060_s3 + $0x10] ss:$8 sps:$4 sm:$0xff]   ;;  %v2890_v22 = vld [vmem:[%s4060_s3 + $0x24] ss:$8 sps:$4 sm:$0xff]  }
  0x75   : > { %v485_v6 = vld [vmem:[%s3452_s18] sm:$0xff]  ;;  %v486_v7 = vld [vmem:[%s3452_s18 + $0x8] sm:$0xff]  ;;  %592 = vmatprep.subr.bf16.mxu0 %v584_v8  ;;  %v487_v11 = vld [vmem:[%s3452_s18 + $0x10] sm:$0xff]  ;;  %705 = vmatprep.subr.bf16.mxu1 %v590_v16  ;;  %s474_s13 = sand.u32 1, %s3216_s26   ;;  %s2585_s27 = sshll.u32 %s3329_s29, 11 }
  0x76   : > { %v501_v10 = vpack.c.bf16 %v486_v7, %v485_v6  ;;  %593 = vmatpush1.bf16.msra.mxu0 %v581_v9  ;;  %v488_v12 = vld [vmem:[%s3452_s18 + $0x18] sm:$0xff]  ;;  %706 = vmatpush1.bf16.msra.mxu1 %v587_v18  ;;  %v489_v23 = vld [vmem:[%s3452_s18 + $0x20] sm:$0xff]  ;;  %v490_v24 = vld [vmem:[%s3452_s18 + $0x28] sm:$0xff]  ;;  %v3599_v6 = vshrl.u32 %v515_v5, 7  ;;  %s2452_s5 = sshll.u32 %s474_s13, 7  ;;  %s4103_s19 = sld [smem:[#allocation17_spill]] }
  0x77   : > { %1310 = vmatprep.subr.bf16.mxu0 %v2884_v17  ;;  %v502_v20 = vpack.c.bf16 %v488_v12, %v487_v11  ;;  %v2888_v25 = vld [vmem:[%s4060_s3 + $0x20] ss:$8 sps:$4 sm:$0xff]   ;;  %v2893_v26 = vld [vmem:[%s4060_s3 + $0x34] ss:$8 sps:$4 sm:$0xff]   ;;  %v503_v27 = vpack.c.bf16 %v490_v24, %v489_v23  ;;  %v2891_v28 = vld [vmem:[%s4060_s3 + $0x30] ss:$8 sps:$4 sm:$0xff]  }
  0x78   : > { %v2896_v29 = vld [vmem:[%s4060_s3 + $0x44] ss:$8 sps:$4 sm:$0xff]   ;;  %v491_v30 = vld [vmem:[%s3452_s18 + $0x30] sm:$0xff]  ;;  %v492_v31 = vld [vmem:[%s3452_s18 + $0x38] sm:$0xff]  ;;  %v517_v7 = vsub.s32 0, %v3599_v6  ;;  %v521_v9 = vsub.s32 1, %v3599_v6 }
  0x79   : > { %2459 = vmatmul.mubr.msk.bf16.vlgmr.msra.gmra.mrb[0].mxu0 %vm551_vm2, %v501_v10  ;;  %2467 = vmatmul.mubr.msk.bf16.vlgmr.msra.gmra.mrb[0].mxu1 %vm551_vm2, %v501_v10  ;;  %v2894_v32 = vld [vmem:[%s4060_s3 + $0x40] ss:$8 sps:$4 sm:$0xff]   ;;  %v2899_v33 = vld [vmem:[%s4060_s3 + $0x54] ss:$8 sps:$4 sm:$0xff]   ;;  %v2897_v34 = vld [vmem:[%s4060_s3 + $0x50] ss:$8 sps:$4 sm:$0xff]   ;;  %v504_v35 = vpack.c.bf16 %v492_v31, %v491_v30 }
  0x7a   : > { %634 = vmatprep.mubr.bf16.mxu0 %v3233_v0  ;;  %1311 = vmatpush1.bf16.msra.mxu0 %v2882_v15  ;;  %v2902_v36 = vld [vmem:[%s4060_s3 + $0x64] ss:$8 sps:$4 sm:$0xff]   ;;  %v2900_v39 = vld [vmem:[%s4060_s3 + $0x60] ss:$8 sps:$4 sm:$0xff]   ;;  %v2905_v40 = vld [vmem:[%s4060_s3 + $0x74] ss:$8 sps:$4 sm:$0xff]  }
  0x7b   : > { %1312 = vmatprep.subr.bf16.mxu0 %v2887_v19  ;;  %747 = vmatprep.mubr.bf16.mxu1 %v3233_v0  ;;  %v493_v37 = vld [vmem:[%s3452_s18 + $0x40] sm:$0xff]  ;;  %v494_v38 = vld [vmem:[%s3452_s18 + $0x48] sm:$0xff]  ;;  %v2903_v41 = vld [vmem:[%s4060_s3 + $0x70] ss:$8 sps:$4 sm:$0xff]   ;;  %v525_v13 = vsub.s32 2, %v3599_v6  ;;  %v529_v16 = vsub.s32 3, %v3599_v6 }
  0x7c   : > { %v505_v42 = vpack.c.bf16 %v494_v38, %v493_v37  ;;  %v2908_v43 = vld [vmem:[%s4060_s3 + $0x84] ss:$8 sps:$4 sm:$0xff]   ;;  %v495_v44 = vld [vmem:[%s3452_s18 + $0x50] sm:$0xff]  ;;  %v496_v45 = vld [vmem:[%s3452_s18 + $0x58] sm:$0xff]  ;;  %s3955_s21 = scalar_lea.vmem [#allocation8], %s2452_s5  ;;  %s4104_s24 = sld [smem:[#allocation20_spill]] }
  0x7d   : > { %v2906_v46 = vld [vmem:[%s4060_s3 + $0x80] ss:$8 sps:$4 sm:$0xff]   ;;  %v2911_v47 = vld [vmem:[%s4060_s3 + $0x94] ss:$8 sps:$4 sm:$0xff]   ;;  %v2909_v48 = vld [vmem:[%s4060_s3 + $0x90] ss:$8 sps:$4 sm:$0xff]   ;;  %v506_v49 = vpack.c.bf16 %v496_v45, %v495_v44 }
  0x7e   : > { %1313 = vmatpush1.bf16.msra.mxu0 %v2885_v21  ;;  %v2914_v50 = vld [vmem:[%s4060_s3 + $0xa4] ss:$8 sps:$4 sm:$0xff]   ;;  %v2912_v53 = vld [vmem:[%s4060_s3 + $0xa0] ss:$8 sps:$4 sm:$0xff]   ;;  %v2917_v54 = vld [vmem:[%s4060_s3 + $0xb4] ss:$8 sps:$4 sm:$0xff]  }
  0x7f   : > { %1314 = vmatprep.subr.bf16.mxu0 %v2890_v22  ;;  %v497_v51 = vld [vmem:[%s3452_s18 + $0x60] sm:$0xff]  ;;  %v498_v52 = vld [vmem:[%s3452_s18 + $0x68] sm:$0xff]  ;;  %v2915_v55 = vld [vmem:[%s4060_s3 + $0xb0] ss:$8 sps:$4 sm:$0xff]   ;;  %s2349_s14 = sshll.u32 %s3955_s21, 4  ;;  %s4016_s29 = scalar_lea.sflag [#allocation4], %s474_s13  ;;  %s4008_s14 = int_to_ptr.vmem [resolvable:$true] %s2349_s14 }
  0x80   : > { %v507_v56 = vpack.c.bf16 %v498_v52, %v497_v51  ;;  %v2920_v57 = vld [vmem:[%s4060_s3 + $0xc4] ss:$8 sps:$4 sm:$0xff]   ;;  %v499_v58 = vld [vmem:[%s3452_s18 + $0x70] sm:$0xff]  ;;  %v500_v59 = vld [vmem:[%s3452_s18 + $0x78] sm:$0xff]  ;;  %s3154_s15 = scalar_lea.vmem %s4008_s14, 2048  ;;  %p4105_p1 = scmp.ne.s32.totalorder %s4103_s19, 0 }
  0x81   : > { %2460 = vmatmul.mubr.msk.bf16.gmra.mrb[4].mxu0 %vm551_vm2, %v502_v20  ;;  %2468 = vmatmul.mubr.msk.bf16.gmra.mrb[4].mxu1 %vm551_vm2, %v502_v20  ;;  %v2918_v60 = vld [vmem:[%s4060_s3 + $0xc0] ss:$8 sps:$4 sm:$0xff]   ;;  %v2923_v61 = vld [vmem:[%s4060_s3 + $0xd4] ss:$8 sps:$4 sm:$0xff]   ;;  %v508_v62 = vpack.c.bf16 %v500_v59, %v499_v58  ;;  %v2921_v63 = vld [vmem:[%s4060_s3 + $0xd0] ss:$8 sps:$4 sm:$0xff]   ;;  %p3155_p10 = scmp.ne.s32.totalorder %s4008_s14, %s3154_s15 }
  0x82   : > { %644 = vmatprep.mubr.bf16.mxu0 %v3233_v0  ;;  %1315 = vmatpush1.bf16.msra.mxu0 %v2888_v25  ;;  %v2926_v1 = vld [vmem:[%s4060_s3 + $0xe4] ss:$8 sps:$4 sm:$0xff]   ;;  %v2924_v2 = vld [vmem:[%s4060_s3 + $0xe0] ss:$8 sps:$4 sm:$0xff]   ;;  %v2929_v3 = vld [vmem:[%s4060_s3 + $0xf4] ss:$8 sps:$4 sm:$0xff]   ;;  %s4006_s18 = scalar_lea.hbm %s4104_s24, %s2585_s27 }
  0x83   : > { %1316 = vmatprep.subr.bf16.mxu0 %v2893_v26  ;;  %757 = vmatprep.mubr.bf16.mxu1 %v3233_v0  ;;  %v2932_v4 = vld [vmem:[%s4060_s3 + $0x104] ss:$8 sps:$4 sm:$0xff]   ;;  %v513_v8 = vld [vmem:[%s4059_s2] sm:$0xf]  ;;  %p3156_p2 = pnand %p3155_p10, %p4105_p1  ;;  %s3235_s22 = smov [#allocation8]  }
  0x84   : > { %v3608_v10 = vrot.slane %v513_v8, %v517_v7  ;;  %v3612_v11 = vrot.slane %v513_v8, %v521_v9  ;;  %v2978_v21 = vld [vmem:[#allocation5 + $0x40] sm:$0xff]   ;;  %v2980_v23 = vld [vmem:[#allocation5 + $0x48] sm:$0xff]   ;;  %v3620_v25 = vrot.slane %v513_v8, %v525_v13  ;;  %s3158_s30 = sshll.u32 %s3235_s22, 4  ;;  %s3159_s30 = int_to_ptr.vmem [resolvable:$false] %s3158_s30 }
  0x85   : > { %v2979_v22 = vld [vmem:[#allocation5] sm:$0xff]   ;;  %2586 = vmatprep.subr.bf16.mxu1 %v2978_v21  ;;  %v2981_v31 = vld [vmem:[#allocation5 + $0x8] sm:$0xff]   ;;  %p3157_p3 = pneg %p3156_p2  ;;  %s3160_s25 = scalar_lea.vmem %s3159_s30, 4096 }
  0x86   : > { %1317 = vmatpush1.bf16.msra.mxu0 %v2891_v28  ;;  %v3622_v28 = vrot.slane %v513_v8, %v529_v16  ;;  %2587 = vmatpush3.bf16.msra.mxu1 %v2979_v22  ;;  %v2930_v37 = vld [vmem:[%s4060_s3 + $0x100] ss:$8 sps:$4 sm:$0xff]   ;;  %p3161_p4 = scmp.lt.s32.totalorder %s4008_s14, %s3159_s30  ;;  %p3162_p7 = scmp.lt.s32.totalorder %s3160_s25, %s3154_s15 }
  0x87   : > { %1318 = vmatprep.subr.bf16.mxu0 %v2896_v29  ;;  %2588 = vmatprep.subr.bf16.mxu1 %v2980_v23  ;;  %v2986_v8 = vld [vmem:[#allocation5 + $0x60] sm:$0xff]  }
  0x88   : > { %p3163_p8 = por %p3162_p7, %p3161_p4 }
  0x89   : > { %2461 = vmatmul.mubr.msk.bf16.gmra.mrb[8].mxu0 %vm551_vm2, %v503_v27  ;;  %2469 = vmatmul.mubr.msk.bf16.gmra.mrb[8].mxu1 %vm551_vm2, %v503_v27 }
  0x8a   : > { %654 = vmatprep.mubr.bf16.mxu0 %v3233_v0  ;;  %1319 = vmatpush1.bf16.msra.mxu0 %v2894_v32  ;;  %p3164_p11 = pnand %p3163_p8, %p3157_p3 }
  0x8b   : > { %1320 = vmatprep.subr.bf16.mxu0 %v2899_v33  ;;  %767 = vmatprep.mubr.bf16.mxu1 %v3233_v0 }
  0x8c   : > { %2589 = vmatpush3.bf16.msra.mxu1 %v2981_v31 }
  0x8e   : > { %1321 = vmatpush1.bf16.msra.mxu0 %v2897_v34  ;;  %v2982_v34 = vld [vmem:[#allocation5 + $0x50] sm:$0xff]  }
  0x8f   : > { %1322 = vmatprep.subr.bf16.mxu0 %v2902_v36  ;;  %2590 = vmatprep.subr.bf16.mxu1 %v2982_v34  ;;  %v2988_v34 = vld [vmem:[#allocation5 + $0x68] sm:$0xff]  }
  0x91   : > { %2462 = vmatmul.mubr.msk.bf16.gmra.mrb[12].mxu0 %vm551_vm2, %v504_v35  ;;  %2470 = vmatmul.mubr.msk.bf16.gmra.mrb[12].mxu1 %vm551_vm2, %v504_v35 }
  0x92   : > { %664 = vmatprep.mubr.bf16.mxu0 %v3233_v0  ;;  %1323 = vmatpush1.bf16.msra.mxu0 %v2900_v39 }
  0x93   : > { %1324 = vmatprep.subr.bf16.mxu0 %v2905_v40  ;;  %777 = vmatprep.mubr.bf16.mxu1 %v3233_v0 }
  0x96   : > { %1325 = vmatpush1.bf16.msra.mxu0 %v2903_v41 }
  0x97   : > { %1326 = vmatprep.subr.bf16.mxu0 %v2908_v43 }
  0x99   : > { %2463 = vmatmul.mubr.msk.bf16.gmra.mrb[16].mxu0 %vm551_vm2, %v505_v42  ;;  %2471 = vmatmul.mubr.msk.bf16.gmra.mrb[16].mxu1 %vm551_vm2, %v505_v42  ;;  %v2935_v42 = vld [vmem:[%s4060_s3 + $0x114] ss:$8 sps:$4 sm:$0xff]  }
  0x9a   : > { %674 = vmatprep.mubr.bf16.mxu0 %v3233_v0  ;;  %1327 = vmatpush1.bf16.msra.mxu0 %v2906_v46 }
  0x9b   : > { %1328 = vmatprep.subr.bf16.mxu0 %v2911_v47  ;;  %787 = vmatprep.mubr.bf16.mxu1 %v3233_v0 }
  0x9e   : > { %1329 = vmatpush1.bf16.msra.mxu0 %v2909_v48 }
  0x9f   : > { %1330 = vmatprep.subr.bf16.mxu0 %v2914_v50  ;;  %v2983_v50 = vld [vmem:[#allocation5 + $0x10] sm:$0xff]  }
  0xa0   : > { %2591 = vmatpush3.bf16.msra.mxu1 %v2983_v50 }
  0xa1   : > { %2464 = vmatmul.mubr.msk.bf16.gmra.mrb[20].mxu0 %vm551_vm2, %v506_v49  ;;  %2472 = vmatmul.mubr.msk.bf16.gmra.mrb[20].mxu1 %vm551_vm2, %v506_v49 }
  0xa2   : > { %684 = vmatprep.mubr.bf16.mxu0 %v3233_v0  ;;  %1331 = vmatpush1.bf16.msra.mxu0 %v2912_v53 }
  0xa3   : > { %1332 = vmatprep.subr.bf16.mxu0 %v2917_v54  ;;  %797 = vmatprep.mubr.bf16.mxu1 %v3233_v0 }
  0xa6   : > { %1333 = vmatpush1.bf16.msra.mxu0 %v2915_v55  ;;  %v2984_v55 = vld [vmem:[#allocation5 + $0x58] sm:$0xff]  }
  0xa7   : > { %1334 = vmatprep.subr.bf16.mxu0 %v2920_v57  ;;  %v2933_v57 = vld [vmem:[%s4060_s3 + $0x110] ss:$8 sps:$4 sm:$0xff]   ;;  %2592 = vmatprep.subr.bf16.mxu1 %v2984_v55 }
  0xa9   : > { %2465 = vmatmul.mubr.msk.bf16.gmra.mrb[24].mxu0 %vm551_vm2, %v507_v56  ;;  %2473 = vmatmul.mubr.msk.bf16.gmra.mrb[24].mxu1 %vm551_vm2, %v507_v56 }
  0xaa   : > { %694 = vmatprep.mubr.bf16.mxu0 %v3233_v0  ;;  %1335 = vmatpush1.bf16.msra.mxu0 %v2918_v60 }
  0xab   : > { %1336 = vmatprep.subr.bf16.mxu0 %v2923_v61  ;;  %807 = vmatprep.mubr.bf16.mxu1 %v3233_v0  ;;  %v2927_v0 = vld [vmem:[%s4060_s3 + $0xf0] ss:$8 sps:$4 sm:$0xff]   ;;  %v2938_v61 = vld [vmem:[%s4060_s3 + $0x124] ss:$8 sps:$4 sm:$0xff]  }
  0xae   : > { %1337 = vmatpush1.bf16.msra.mxu0 %v2921_v63 }
  0xaf   : > { %1338 = vmatprep.subr.bf16.mxu0 %v2926_v1 }
  0xb1   : > { %2466 = vmatmul.mubr.msk.bf16.gmra.mrb[28].mxu0 %vm551_vm2, %v508_v62  ;;  %2474 = vmatmul.mubr.msk.bf16.gmra.mrb[28].mxu1 %vm551_vm2, %v508_v62 }
  0xb2   : > { %1339 = vmatpush1.bf16.msra.mxu0 %v2924_v2 }
  0xb3   : > { %1340 = vmatprep.subr.bf16.mxu0 %v2929_v3  ;;  %v2985_v3 = vld [vmem:[#allocation5 + $0x18] sm:$0xff]  }
  0xb4   : > { %2593 = vmatpush3.bf16.msra.mxu1 %v2985_v3  ;;  %v2991_v3 = vld [vmem:[#allocation5 + $0x30] sm:$0xff]  }
  0xb5   : > { %2594 = vmatprep.subr.bf16.mxu1 %v2986_v8 }
  0xb6   : > { %1341 = vmatpush1.bf16.msra.mxu0 %v2927_v0 }
  0xb7   : > { %1423 = vmatprep.subr.bf16.mxu0 %v2932_v4 }
 0x14c   : > { %v626_v12 = vpop.f32.mrb[0].mxu0  ;;  %v739_v33 = vpop.f32.mrb[0].mxu1 }
 0x14d   : > { %v627_v14 = vadd.f32 %v626_v12, %v3608_v10  ;;  %v628_v15 = vpop.f32.mrb[1].mxu0  ;;  %v740_v38 = vadd.f32 %v739_v33, %v3620_v25  ;;  %v741_v39 = vpop.f32.mrb[1].mxu1 }
 0x14e   : > { %v629_v17 = vadd.f32 %v628_v15, %v3612_v11  ;;  %v630_v18 = vpop.f32.mrb[2].mxu0  ;;  %v742_v43 = vadd.f32 %v741_v39, %v3622_v28  ;;  %v743_v44 = vpop.f32.mrb[2].mxu1 }
 0x14f   : > { %v631_v19 = vadd.f32 %v630_v18, %v3608_v10  ;;  %v632_v20 = vpop.f32.mrb[3].mxu0  ;;  %v818_v26 = vmax.f32 %v627_v14, 0.0  ;;  %v820_v47 = vmax.f32 %v740_v38, 0.0  ;;  %v744_v48 = vadd.f32 %v743_v44, %v3620_v25  ;;  %v745_v49 = vpop.f32.mrb[3].mxu1  ;;  %v2936_v14 = vld [vmem:[%s4060_s3 + $0x120] ss:$8 sps:$4 sm:$0xff]  }
 0x150   : > { %v633_v24 = vadd.f32 %v632_v20, %v3612_v11  ;;  %v819_v29 = vmax.f32 %v629_v17, 0.0  ;;  %v821_v53 = vmax.f32 %v742_v43, 0.0  ;;  %v746_v54 = vadd.f32 %v745_v49, %v3622_v28  ;;  %v2990_v49 = vld [vmem:[#allocation5 + $0x70] sm:$0xff]  }
 0x151   : > { %v822_v27 = vmax.f32 %v631_v19, 0.0  ;;  %v824_v58 = vmax.f32 %v744_v48, 0.0  ;;  %v2941_v19 = vld [vmem:[%s4060_s3 + $0x134] ss:$8 sps:$4 sm:$0xff]  }
 0x152   : > { %v823_v30 = vmax.f32 %v633_v24, 0.0  ;;  %v825_v62 = vmax.f32 %v746_v54, 0.0 }
 0x153   : > { %v882_v32 = vpack.c.bf16 %v822_v27, %v818_v26  ;;  %v3644_v2 = vpack.c.bf16 %v824_v58, %v820_v47 }
 0x154   : > { %v883_v35 = vpack.c.bf16 %v823_v30, %v819_v29  ;;  %v636_v36 = vpop.f32.mrb[4].mxu0  ;;  %v3646_v4 = vpack.c.bf16 %v825_v62, %v821_v53  ;;  %v749_v5 = vpop.f32.mrb[4].mxu1  ;;  %v2987_v29 = vld [vmem:[#allocation5 + $0x20] sm:$0xff]  }
 0x155   : > { %v637_v40 = vadd.f32 %v636_v36, %v3608_v10  ;;  %v638_v41 = vpop.f32.mrb[5].mxu0  ;;  %v750_v15 = vadd.f32 %v749_v5, %v3620_v25  ;;  %v751_v16 = vpop.f32.mrb[5].mxu1  ;;  %v2939_v36 = vld [vmem:[%s4060_s3 + $0x130] ss:$8 sps:$4 sm:$0xff]   ;;  %2595 = vmatpush3.bf16.msra.mxu1 %v2987_v29 }
 0x156   : > { %v639_v45 = vadd.f32 %v638_v41, %v3612_v11  ;;  %v640_v46 = vpop.f32.mrb[6].mxu0  ;;  %1342 = vmatprep.mubr.bf16.mxu0 %v883_v35  ;;  %v752_v20 = vadd.f32 %v751_v16, %v3622_v28  ;;  %v753_v21 = vpop.f32.mrb[6].mxu1  ;;  %2596 = vmatprep.subr.bf16.mxu1 %v2988_v34 }
 0x157   : > { %v641_v51 = vadd.f32 %v640_v46, %v3608_v10  ;;  %v642_v52 = vpop.f32.mrb[7].mxu0  ;;  %1343 = vmatmul.mubr.bf16.vlgmr.msra.gmra.mrb[32].mxu0 %v882_v32  ;;  %v826_v59 = vmax.f32 %v637_v40, 0.0  ;;  %v828_v24 = vmax.f32 %v750_v15, 0.0  ;;  %v754_v26 = vadd.f32 %v753_v21, %v3620_v25  ;;  %v755_v27 = vpop.f32.mrb[7].mxu1  ;;  %v2944_v40 = vld [vmem:[%s4060_s3 + $0x144] ss:$8 sps:$4 sm:$0xff]  }
 0x158   : > { %v643_v56 = vadd.f32 %v642_v52, %v3612_v11  ;;  %1424 = vmatpush1.bf16.msra.mxu0 %v2930_v37  ;;  %v827_v63 = vmax.f32 %v639_v45, 0.0  ;;  %v829_v32 = vmax.f32 %v752_v20, 0.0  ;;  %v756_v33 = vadd.f32 %v755_v27, %v3622_v28  ;;  %v2989_v45 = vld [vmem:[#allocation5 + $0x28] sm:$0xff]  }
 0x159   : > { %v830_v60 = vmax.f32 %v641_v51, 0.0  ;;  %1425 = vmatprep.subr.bf16.mxu0 %v2935_v42  ;;  %v832_v37 = vmax.f32 %v754_v26, 0.0  ;;  %v2942_v52 = vld [vmem:[%s4060_s3 + $0x140] ss:$8 sps:$4 sm:$0xff]   ;;  %2597 = vmatpush3.bf16.msra.mxu1 %v2989_v45 }
 0x15a   : > { %v831_v1 = vmax.f32 %v643_v56, 0.0  ;;  %v833_v41 = vmax.f32 %v756_v33, 0.0  ;;  %2598 = vmatprep.subr.bf16.mxu1 %v2990_v49 }
 0x15b   : > { %v886_v0 = vpack.c.bf16 %v830_v60, %v826_v59  ;;  %v3668_v44 = vpack.c.bf16 %v832_v37, %v828_v24 }
 0x15c   : > { %v887_v12 = vpack.c.bf16 %v831_v1, %v827_v63  ;;  %1426 = vmatpush1.bf16.msra.mxu0 %v2933_v57  ;;  %v646_v13 = vpop.f32.mrb[8].mxu0  ;;  %v3670_v47 = vpack.c.bf16 %v833_v41, %v829_v32  ;;  %v759_v48 = vpop.f32.mrb[8].mxu1  ;;  %v2947_v57 = vld [vmem:[%s4060_s3 + $0x154] ss:$8 sps:$4 sm:$0xff]  }
 0x15d   : > { %v647_v17 = vadd.f32 %v646_v13, %v3608_v10  ;;  %v648_v18 = vpop.f32.mrb[9].mxu0  ;;  %1427 = vmatprep.subr.bf16.mxu0 %v2938_v61  ;;  %v760_v53 = vadd.f32 %v759_v48, %v3620_v25  ;;  %v761_v54 = vpop.f32.mrb[9].mxu1  ;;  %2599 = vmatpush3.bf16.msra.mxu1 %v2991_v3 }
 0x15e   : > { %v649_v22 = vadd.f32 %v648_v18, %v3612_v11  ;;  %v650_v23 = vpop.f32.mrb[10].mxu0  ;;  %1352 = vmatprep.mubr.bf16.mxu0 %v887_v12  ;;  %v762_v58 = vadd.f32 %v761_v54, %v3622_v28  ;;  %v763_v59 = vpop.f32.mrb[10].mxu1  ;;  %v2950_v18 = vld [vmem:[%s4060_s3 + $0x164] ss:$8 sps:$4 sm:$0xff]  }
 0x15f   : > { %v651_v30 = vadd.f32 %v650_v23, %v3608_v10  ;;  %v652_v31 = vpop.f32.mrb[11].mxu0  ;;  %1353 = vmatmul.mubr.bf16.gmra.mrb[36].mxu0 %v886_v0  ;;  %v834_v38 = vmax.f32 %v647_v17, 0.0  ;;  %v836_v62 = vmax.f32 %v760_v53, 0.0  ;;  %v764_v63 = vadd.f32 %v763_v59, %v3620_v25  ;;  %v765_v1 = vpop.f32.mrb[11].mxu1  ;;  %v2956_v54 = vld [vmem:[%s4060_s3 + $0x184] ss:$8 sps:$4 sm:$0xff]  }
 0x160   : > { %v653_v35 = vadd.f32 %v652_v31, %v3612_v11  ;;  %1428 = vmatpush1.bf16.msra.mxu0 %v2936_v14  ;;  %v835_v42 = vmax.f32 %v649_v22, 0.0  ;;  %v837_v8 = vmax.f32 %v762_v58, 0.0  ;;  %v766_v12 = vadd.f32 %v765_v1, %v3622_v28  ;;  %v2945_v14 = vld [vmem:[%s4060_s3 + $0x150] ss:$8 sps:$4 sm:$0xff]   ;;  %v2954_v1 = vld [vmem:[%s4060_s3 + $0x180] ss:$8 sps:$4 sm:$0xff]  }
 0x161   : > { %v838_v39 = vmax.f32 %v651_v30, 0.0  ;;  %1429 = vmatprep.subr.bf16.mxu0 %v2941_v19  ;;  %v840_v15 = vmax.f32 %v764_v63, 0.0  ;;  %v2948_v30 = vld [vmem:[%s4060_s3 + $0x160] ss:$8 sps:$4 sm:$0xff]  }
 0x162   : > { %v839_v43 = vmax.f32 %v653_v35, 0.0  ;;  %v841_v19 = vmax.f32 %v766_v12, 0.0  ;;  %v2953_v35 = vld [vmem:[%s4060_s3 + $0x174] ss:$8 sps:$4 sm:$0xff]  }
 0x163   : > { %v890_v46 = vpack.c.bf16 %v838_v39, %v834_v38  ;;  %v3692_v22 = vpack.c.bf16 %v840_v15, %v836_v62  ;;  %v2959_v12 = vld [vmem:[%s4060_s3 + $0x194] ss:$8 sps:$4 sm:$0xff]  }
 0x164   : > { %v891_v50 = vpack.c.bf16 %v839_v43, %v835_v42  ;;  %1430 = vmatpush1.bf16.msra.mxu0 %v2939_v36  ;;  %v656_v51 = vpop.f32.mrb[12].mxu0  ;;  %v3694_v24 = vpack.c.bf16 %v841_v19, %v837_v8  ;;  %v769_v26 = vpop.f32.mrb[12].mxu1 }
 0x165   : > { %v657_v55 = vadd.f32 %v656_v51, %v3608_v10  ;;  %v658_v56 = vpop.f32.mrb[13].mxu0  ;;  %1431 = vmatprep.subr.bf16.mxu0 %v2944_v40  ;;  %v770_v31 = vadd.f32 %v769_v26, %v3620_v25  ;;  %v771_v32 = vpop.f32.mrb[13].mxu1 }
 0x166   : > { %v659_v60 = vadd.f32 %v658_v56, %v3612_v11  ;;  %v660_v61 = vpop.f32.mrb[14].mxu0  ;;  %1362 = vmatprep.mubr.bf16.mxu0 %v891_v50  ;;  %v772_v36 = vadd.f32 %v771_v32, %v3622_v28  ;;  %v773_v37 = vpop.f32.mrb[14].mxu1  ;;  %v2951_v50 = vld [vmem:[%s4060_s3 + $0x170] ss:$8 sps:$4 sm:$0xff]  }
 0x167   : > { %v661_v0 = vadd.f32 %v660_v61, %v3608_v10  ;;  %v662_v5 = vpop.f32.mrb[15].mxu0  ;;  %1363 = vmatmul.mubr.bf16.gmra.mrb[40].mxu0 %v890_v46  ;;  %v842_v16 = vmax.f32 %v657_v55, 0.0  ;;  %v844_v40 = vmax.f32 %v770_v31, 0.0  ;;  %v774_v41 = vadd.f32 %v773_v37, %v3620_v25  ;;  %v775_v42 = vpop.f32.mrb[15].mxu1 }
 0x168   : > { %v663_v13 = vadd.f32 %v662_v5, %v3612_v11  ;;  %1432 = vmatpush1.bf16.msra.mxu0 %v2942_v52  ;;  %v843_v20 = vmax.f32 %v659_v60, 0.0  ;;  %v845_v46 = vmax.f32 %v772_v36, 0.0  ;;  %v776_v48 = vadd.f32 %v775_v42, %v3622_v28 }
 0x169   : > { %v846_v17 = vmax.f32 %v661_v0, 0.0  ;;  %1433 = vmatprep.subr.bf16.mxu0 %v2947_v57  ;;  %v848_v51 = vmax.f32 %v774_v41, 0.0 }
 0x16a   : > { %v847_v21 = vmax.f32 %v663_v13, 0.0  ;;  %v849_v55 = vmax.f32 %v776_v48, 0.0 }
 0x16b   : > { %v894_v23 = vpack.c.bf16 %v846_v17, %v842_v16  ;;  %v3716_v58 = vpack.c.bf16 %v848_v51, %v844_v40 }
 0x16c   : > { %v895_v27 = vpack.c.bf16 %v847_v21, %v843_v20  ;;  %1434 = vmatpush1.bf16.msra.mxu0 %v2945_v14  ;;  %v666_v29 = vpop.f32.mrb[16].mxu0  ;;  %v3718_v60 = vpack.c.bf16 %v849_v55, %v845_v46  ;;  %v779_v61 = vpop.f32.mrb[16].mxu1 }
 0x16d   : > { %v667_v33 = vadd.f32 %v666_v29, %v3608_v10  ;;  %v668_v34 = vpop.f32.mrb[17].mxu0  ;;  %1435 = vmatprep.subr.bf16.mxu0 %v2950_v18  ;;  %v780_v3 = vadd.f32 %v779_v61, %v3620_v25  ;;  %v781_v0 = vpop.f32.mrb[17].mxu1  ;;  %v2957_v29 = vld [vmem:[%s4060_s3 + $0x190] ss:$8 sps:$4 sm:$0xff]  }
 0x16e   : > { %v669_v38 = vadd.f32 %v668_v34, %v3612_v11  ;;  %v670_v39 = vpop.f32.mrb[18].mxu0  ;;  %1372 = vmatprep.mubr.bf16.mxu0 %v895_v27  ;;  %v782_v13 = vadd.f32 %v781_v0, %v3622_v28  ;;  %v783_v14 = vpop.f32.mrb[18].mxu1 }
 0x16f   : > { %v671_v43 = vadd.f32 %v670_v39, %v3608_v10  ;;  %v672_v45 = vpop.f32.mrb[19].mxu0  ;;  %1373 = vmatmul.mubr.bf16.gmra.mrb[44].mxu0 %v894_v23  ;;  %v850_v52 = vmax.f32 %v667_v33, 0.0  ;;  %v852_v17 = vmax.f32 %v780_v3, 0.0  ;;  %v784_v18 = vadd.f32 %v783_v14, %v3620_v25  ;;  %v785_v19 = vpop.f32.mrb[19].mxu1  ;;  %v2962_v33 = vld [vmem:[%s4060_s3 + $0x1a4] ss:$8 sps:$4 sm:$0xff]  }
 0x170   : > { %v673_v49 = vadd.f32 %v672_v45, %v3612_v11  ;;  %1436 = vmatpush1.bf16.msra.mxu0 %v2948_v30  ;;  %v851_v56 = vmax.f32 %v669_v38, 0.0  ;;  %v853_v23 = vmax.f32 %v782_v13, 0.0  ;;  %v786_v26 = vadd.f32 %v785_v19, %v3622_v28  ;;  %v2963_v3 = vld [vmem:[%s4060_s3 + $0x1b0] ss:$8 sps:$4 sm:$0xff]  }
 0x171   : > { %v854_v53 = vmax.f32 %v671_v43, 0.0  ;;  %1437 = vmatprep.subr.bf16.mxu0 %v2953_v35  ;;  %v856_v30 = vmax.f32 %v784_v18, 0.0  ;;  %v2960_v43 = vld [vmem:[%s4060_s3 + $0x1a0] ss:$8 sps:$4 sm:$0xff]  }
 0x172   : > { %v855_v57 = vmax.f32 %v673_v49, 0.0  ;;  %v857_v34 = vmax.f32 %v786_v26, 0.0 }
 0x173   : > { %v898_v59 = vpack.c.bf16 %v854_v53, %v850_v52  ;;  %v3740_v37 = vpack.c.bf16 %v856_v30, %v852_v17 }
 0x174   : > { %v899_v62 = vpack.c.bf16 %v855_v57, %v851_v56  ;;  %1438 = vmatpush1.bf16.msra.mxu0 %v2951_v50  ;;  %v676_v63 = vpop.f32.mrb[20].mxu0  ;;  %v3742_v39 = vpack.c.bf16 %v857_v34, %v853_v23  ;;  %v789_v40 = vpop.f32.mrb[20].mxu1  ;;  %v2965_v50 = vld [vmem:[%s4060_s3 + $0x1b4] ss:$8 sps:$4 sm:$0xff]   ;;  %v2966_v23 = vld [vmem:[%s4060_s3 + $0x1c0] ss:$8 sps:$4 sm:$0xff]  }
 0x175   : > { %v677_v5 = vadd.f32 %v676_v63, %v3608_v10  ;;  %v678_v8 = vpop.f32.mrb[21].mxu0  ;;  %1439 = vmatprep.subr.bf16.mxu0 %v2956_v54  ;;  %v790_v45 = vadd.f32 %v789_v40, %v3620_v25  ;;  %v791_v46 = vpop.f32.mrb[21].mxu1 }
 0x176   : > { %v679_v15 = vadd.f32 %v678_v8, %v3612_v11  ;;  %v680_v16 = vpop.f32.mrb[22].mxu0  ;;  %1382 = vmatprep.mubr.bf16.mxu0 %v899_v62  ;;  %v792_v51 = vadd.f32 %v791_v46, %v3622_v28  ;;  %v793_v52 = vpop.f32.mrb[22].mxu1 }
 0x177   : > { %v681_v20 = vadd.f32 %v680_v16, %v3608_v10  ;;  %v682_v21 = vpop.f32.mrb[23].mxu0  ;;  %1383 = vmatmul.mubr.bf16.gmra.mrb[48].mxu0 %v898_v59  ;;  %v858_v31 = vmax.f32 %v677_v5, 0.0  ;;  %v860_v55 = vmax.f32 %v790_v45, 0.0  ;;  %v794_v56 = vadd.f32 %v793_v52, %v3620_v25  ;;  %v795_v57 = vpop.f32.mrb[23].mxu1 }
 0x178   : > { %v683_v27 = vadd.f32 %v682_v21, %v3612_v11  ;;  %1440 = vmatpush1.bf16.msra.mxu0 %v2954_v1  ;;  %v859_v35 = vmax.f32 %v679_v15, 0.0  ;;  %v861_v62 = vmax.f32 %v792_v51, 0.0  ;;  %v796_v63 = vadd.f32 %v795_v57, %v3622_v28 }
 0x179   : > { %v862_v32 = vmax.f32 %v681_v20, 0.0  ;;  %1441 = vmatprep.subr.bf16.mxu0 %v2959_v12  ;;  %v864_v0 = vmax.f32 %v794_v56, 0.0  ;;  %v2968_v12 = vld [vmem:[%s4060_s3 + $0x1c4] ss:$8 sps:$4 sm:$0xff]  }
 0x17a   : > { %v863_v36 = vmax.f32 %v683_v27, 0.0  ;;  %v865_v13 = vmax.f32 %v796_v63, 0.0 }
 0x17b   : > { %v902_v38 = vpack.c.bf16 %v862_v32, %v858_v31  ;;  %v3764_v16 = vpack.c.bf16 %v864_v0, %v860_v55  ;;  %v2971_v31 = vld [vmem:[%s4060_s3 + $0x1d4] ss:$8 sps:$4 sm:$0xff]  }
 0x17c   : > { %v903_v41 = vpack.c.bf16 %v863_v36, %v859_v35  ;;  %1442 = vmatpush1.bf16.msra.mxu0 %v2957_v29  ;;  %v686_v42 = vpop.f32.mrb[24].mxu0  ;;  %v3766_v18 = vpack.c.bf16 %v865_v13, %v861_v62  ;;  %v799_v19 = vpop.f32.mrb[24].mxu1 }
 0x17d   : > { %v687_v48 = vadd.f32 %v686_v42, %v3608_v10  ;;  %v688_v49 = vpop.f32.mrb[25].mxu0  ;;  %1443 = vmatprep.subr.bf16.mxu0 %v2962_v33  ;;  %v800_v26 = vadd.f32 %v799_v19, %v3620_v25  ;;  %v801_v27 = vpop.f32.mrb[25].mxu1 }
 0x17e   : > { %v689_v53 = vadd.f32 %v688_v49, %v3612_v11  ;;  %v690_v54 = vpop.f32.mrb[26].mxu0  ;;  %1392 = vmatprep.mubr.bf16.mxu0 %v903_v41  ;;  %v802_v32 = vadd.f32 %v801_v27, %v3622_v28  ;;  %v803_v33 = vpop.f32.mrb[26].mxu1 }
 0x17f   : > { %v691_v59 = vadd.f32 %v690_v54, %v3608_v10  ;;  %v692_v61 = vpop.f32.mrb[27].mxu0  ;;  %1393 = vmatmul.mubr.bf16.gmra.mrb[52].mxu0 %v902_v38  ;;  %v866_v5 = vmax.f32 %v687_v48, 0.0  ;;  %v868_v36 = vmax.f32 %v800_v26, 0.0  ;;  %v804_v38 = vadd.f32 %v803_v33, %v3620_v25  ;;  %v805_v40 = vpop.f32.mrb[27].mxu1  ;;  %v2969_v48 = vld [vmem:[%s4060_s3 + $0x1d0] ss:$8 sps:$4 sm:$0xff]  }
 0x180   : > { %v693_v1 = vadd.f32 %v692_v61, %v3612_v11  ;;  %1444 = vmatpush1.bf16.msra.mxu0 %v2960_v43  ;;  %v867_v14 = vmax.f32 %v689_v53, 0.0  ;;  %v869_v43 = vmax.f32 %v802_v32, 0.0  ;;  %v806_v45 = vadd.f32 %v805_v40, %v3622_v28  ;;  %v2972_v61 = vld [vmem:[%s4060_s3 + $0x1e0] ss:$8 sps:$4 sm:$0xff]  }
 0x181   : > { %v870_v8 = vmax.f32 %v691_v59, 0.0  ;;  %1445 = vmatprep.subr.bf16.mxu0 %v2965_v50  ;;  %v872_v49 = vmax.f32 %v804_v38, 0.0  ;;  %v2995_v32 = vld [vmem:[%s4064_s7 + $0x8] sm:$0xff]  }
 0x182   : > { %v871_v15 = vmax.f32 %v693_v1, 0.0  ;;  %v873_v52 = vmax.f32 %v806_v45, 0.0  ;;  %v2977_v1 = vld [vmem:[%s4060_s3 + $0x1f4] ss:$8 sps:$4 sm:$0xff]  }
 0x183   : > { %v906_v17 = vpack.c.bf16 %v870_v8, %v866_v5  ;;  %v908_v55 = vpack.c.bf16 %v872_v49, %v868_v36 }
 0x184   : > { %v907_v20 = vpack.c.bf16 %v871_v15, %v867_v14  ;;  %1446 = vmatpush1.bf16.msra.mxu0 %v2963_v3  ;;  %v696_v21 = vpop.f32.mrb[28].mxu0  ;;  %v909_v57 = vpack.c.bf16 %v873_v52, %v869_v43  ;;  %v2975_v15 = vld [vmem:[%s4060_s3 + $0x1f0] ss:$8 sps:$4 sm:$0xff]  }
 0x185   : > { %v697_v29 = vadd.f32 %v696_v21, %v3608_v10  ;;  %v698_v30 = vpop.f32.mrb[29].mxu0  ;;  %1447 = vmatprep.subr.bf16.mxu0 %v2968_v12 }
 0x186   : > { %v699_v34 = vadd.f32 %v698_v30, %v3612_v11  ;;  %v700_v35 = vpop.f32.mrb[30].mxu0  ;;  %1402 = vmatprep.mubr.bf16.mxu0 %v907_v20 }
 0x187   : > { %v701_v41 = vadd.f32 %v700_v35, %v3608_v10  ;;  %v702_v42 = vpop.f32.mrb[31].mxu0  ;;  %1403 = vmatmul.mubr.bf16.gmra.mrb[56].mxu0 %v906_v17  ;;  %v874_v50 = vmax.f32 %v697_v29, 0.0  ;;  %v2974_v10 = vld [vmem:[%s4060_s3 + $0x1e4] ss:$8 sps:$4 sm:$0xff]  }
 0x188   : > { %v703_v46 = vadd.f32 %v702_v42, %v3612_v11  ;;  %1448 = vmatpush1.bf16.msra.mxu0 %v2966_v23  ;;  %v875_v53 = vmax.f32 %v699_v34, 0.0  ;;  %v809_v11 = vpop.f32.mrb[28].mxu1  ;;  %v2996_v42 = vld [vmem:[%s4064_s7 + $0x10] sm:$0xff]  }
 0x189   : > { %v878_v51 = vmax.f32 %v701_v41, 0.0  ;;  %1449 = vmatprep.subr.bf16.mxu0 %v2971_v31  ;;  %v810_v62 = vadd.f32 %v809_v11, %v3620_v25  ;;  %v811_v63 = vpop.f32.mrb[29].mxu1 }
 0x18a   : > { %v879_v54 = vmax.f32 %v703_v46, 0.0  ;;  %v812_v3 = vadd.f32 %v811_v63, %v3622_v28  ;;  %v813_v0 = vpop.f32.mrb[30].mxu1 }
 0x18b   : > { %v910_v56 = vpack.c.bf16 %v878_v51, %v874_v50  ;;  %v876_v5 = vmax.f32 %v810_v62, 0.0  ;;  %v814_v8 = vadd.f32 %v813_v0, %v3620_v25  ;;  %v815_v12 = vpop.f32.mrb[31].mxu1  ;;  %v2992_v25 = vld [vmem:[#allocation5 + $0x78] sm:$0xff]  }
 0x18c   : > { %v911_v59 = vpack.c.bf16 %v879_v54, %v875_v53  ;;  %1450 = vmatpush1.bf16.msra.mxu0 %v2969_v48  ;;  %v877_v13 = vmax.f32 %v812_v3, 0.0  ;;  %v816_v14 = vadd.f32 %v815_v12, %v3622_v28  ;;  %v2993_v28 = vld [vmem:[#allocation5 + $0x38] sm:$0xff]   ;;  %2600 = vmatprep.subr.bf16.mxu1 %v2992_v25 }
 0x18d   : > { %1451 = vmatprep.subr.bf16.mxu0 %v2974_v10  ;;  %v880_v17 = vmax.f32 %v814_v8, 0.0  ;;  %2601 = vmatpush3.bf16.msra.mxu1 %v2993_v28 }
 0x18e   : > { %1412 = vmatprep.mubr.bf16.mxu0 %v911_v59  ;;  %v881_v19 = vmax.f32 %v816_v14, 0.0 }
 0x18f   : > { %1413 = vmatmul.mubr.bf16.gmra.mrb[60].mxu0 %v910_v56  ;;  %v912_v20 = vpack.c.bf16 %v880_v17, %v876_v5 }
 0x190   : > { %1452 = vmatpush1.bf16.msra.mxu0 %v2972_v61  ;;  %1455 = vmatprep.mubr.bf16.mxu0 %v3646_v4  ;;  %v913_v21 = vpack.c.bf16 %v881_v19, %v877_v13  ;;  %v978_v4 = vld [vmem:[%s4061_s4] sm:$0x3] }
 0x191   : > { %1453 = vmatprep.subr.bf16.mxu0 %v2977_v1 }
 0x194   : > { %1454 = vmatpush1.bf16.msra.mxu0 %v2975_v15 }
 0x197   : > { %1456 = vmatmul.mubr.bf16.vlgmr.msra.gmra.mrb[32].mxu0 %v3644_v2  ;;  %v2994_v2 = vld [vmem:[%s4064_s7] sm:$0xff]  }
 0x198   : > { %1465 = vmatprep.mubr.bf16.mxu0 %v3670_v47  ;;  %2678 = vmatprep.subr.bf16.mxu1 %v2994_v2  ;;  %v3825_v47 = vrot.slane %v978_v4, %v521_v9 }
 0x19f   : > { %1466 = vmatmul.mubr.bf16.gmra.mrb[36].mxu0 %v3668_v44  ;;  %v3821_v44 = vrot.slane %v978_v4, %v517_v7 }
 0x1a0   : > { %1475 = vmatprep.mubr.bf16.mxu0 %v3694_v24 }
 0x1a7   : > { %1476 = vmatmul.mubr.bf16.gmra.mrb[40].mxu0 %v3692_v22 }
 0x1a8   : > { %1485 = vmatprep.mubr.bf16.mxu0 %v3718_v60 }
 0x1af   : > { %1486 = vmatmul.mubr.bf16.gmra.mrb[44].mxu0 %v3716_v58 }
 0x1b0   : > { %1495 = vmatprep.mubr.bf16.mxu0 %v3742_v39 }
 0x1b7   : > { %1496 = vmatmul.mubr.bf16.gmra.mrb[48].mxu0 %v3740_v37 }
 0x1b8   : > { %1505 = vmatprep.mubr.bf16.mxu0 %v3766_v18 }
 0x1bf   : > { %1506 = vmatmul.mubr.bf16.gmra.mrb[52].mxu0 %v3764_v16 }
 0x1c0   : > { %1515 = vmatprep.mubr.bf16.mxu0 %v909_v57 }
 0x1c7   : > { %1516 = vmatmul.mubr.bf16.gmra.mrb[56].mxu0 %v908_v55 }
 0x1c8   : > { %1525 = vmatprep.mubr.bf16.mxu0 %v913_v21 }
 0x1cf   : > { %1526 = vmatmul.mubr.bf16.gmra.mrb[60].mxu0 %v912_v20 }
 0x26a   : > { %v1457_v22 = vpop.f32.mrb[32].mxu0 }
 0x26b   : > { %v2734_v24 = vadd.f32 %v1457_v22, %v3821_v44  ;;  %v1459_v58 = vpop.f32.mrb[33].mxu0 }
 0x26c   : > { %v2735_v60 = vadd.f32 %v1459_v58, %v3825_v47  ;;  %v1461_v37 = vpop.f32.mrb[34].mxu0 }
 0x26d   : > { %v2736_v39 = vadd.f32 %v1461_v37, %v3821_v44  ;;  %v1463_v16 = vpop.f32.mrb[35].mxu0  ;;  %v1536_v23 = vmax.f32 %v2734_v24, 0.0 }
 0x26e   : > { %v2737_v18 = vadd.f32 %v1463_v16, %v3825_v47  ;;  %v1537_v7 = vmax.f32 %v2735_v60, 0.0 }
 0x26f   : > { %v1538_v26 = vmax.f32 %v2736_v39, 0.0 }
 0x270   : > { %v1539_v27 = vmax.f32 %v2737_v18, 0.0 }
 0x271   : > { %v1568_v29 = vpack.c.bf16 %v1538_v26, %v1536_v23 }
 0x272   : > { %v1569_v6 = vpack.c.bf16 %v1539_v27, %v1537_v7  ;;  %v1467_v9 = vpop.f32.mrb[36].mxu0 }
 0x273   : > { %v2738_v30 = vadd.f32 %v1467_v9, %v3821_v44  ;;  %v1469_v31 = vpop.f32.mrb[37].mxu0 }
 0x274   : > { %v2739_v33 = vadd.f32 %v1469_v31, %v3825_v47  ;;  %v1471_v34 = vpop.f32.mrb[38].mxu0  ;;  %1751 = vmatprep.mubr.bf16.mxu1 %v1569_v6 }
 0x275   : > { %v2740_v35 = vadd.f32 %v1471_v34, %v3821_v44  ;;  %v1473_v36 = vpop.f32.mrb[39].mxu0  ;;  %1752 = vmatmul.mubr.bf16.vlgmr.msra.gmra.mrb[32].mxu1 %v1568_v29  ;;  %v1540_v40 = vmax.f32 %v2738_v30, 0.0 }
 0x276   : > { %v2741_v38 = vadd.f32 %v1473_v36, %v3825_v47  ;;  %2679 = vmatpush3.bf16.msra.mxu1 %v2994_v2  ;;  %v1541_v43 = vmax.f32 %v2739_v33, 0.0 }
 0x277   : > { %v1542_v41 = vmax.f32 %v2740_v35, 0.0  ;;  %2680 = vmatprep.subr.bf16.mxu1 %v2995_v32 }
 0x278   : > { %v1543_v45 = vmax.f32 %v2741_v38, 0.0 }
 0x279   : > { %v1570_v46 = vpack.c.bf16 %v1542_v41, %v1540_v40 }
 0x27a   : > { %v1571_v48 = vpack.c.bf16 %v1543_v45, %v1541_v43  ;;  %v1477_v49 = vpop.f32.mrb[40].mxu0  ;;  %2681 = vmatpush3.bf16.msra.mxu1 %v2995_v32 }
 0x27b   : > { %v2742_v50 = vadd.f32 %v1477_v49, %v3821_v44  ;;  %v1479_v51 = vpop.f32.mrb[41].mxu0  ;;  %2682 = vmatprep.subr.bf16.mxu1 %v2996_v42 }
 0x27c   : > { %v2743_v10 = vadd.f32 %v1479_v51, %v3825_v47  ;;  %v1481_v52 = vpop.f32.mrb[42].mxu0  ;;  %1759 = vmatprep.mubr.bf16.mxu1 %v1571_v48 }
 0x27d   : > { %v2744_v53 = vadd.f32 %v1481_v52, %v3821_v44  ;;  %v1483_v54 = vpop.f32.mrb[43].mxu0  ;;  %1760 = vmatmul.mubr.bf16.gmra.mrb[36].mxu1 %v1570_v46  ;;  %v1544_v56 = vmax.f32 %v2742_v50, 0.0 }
 0x27e   : > { %v2745_v55 = vadd.f32 %v1483_v54, %v3825_v47  ;;  %2683 = vmatpush3.bf16.msra.mxu1 %v2996_v42  ;;  %v1545_v11 = vmax.f32 %v2743_v10, 0.0 }
 0x27f   : > { %v1546_v57 = vmax.f32 %v2744_v53, 0.0 }
 0x280   : > { %v1547_v59 = vmax.f32 %v2745_v55, 0.0 }
 0x281   : > { %v1572_v61 = vpack.c.bf16 %v1546_v57, %v1544_v56 }
 0x282   : > { %v1573_v62 = vpack.c.bf16 %v1547_v59, %v1545_v11  ;;  %v1487_v63 = vpop.f32.mrb[44].mxu0 }
 0x283   : > { %v2746_v1 = vadd.f32 %v1487_v63, %v3821_v44  ;;  %v1489_v3 = vpop.f32.mrb[45].mxu0 }
 0x284   : > { %v2747_v0 = vadd.f32 %v1489_v3, %v3825_v47  ;;  %v1491_v5 = vpop.f32.mrb[46].mxu0  ;;  %1767 = vmatprep.mubr.bf16.mxu1 %v1573_v62 }
 0x285   : > { %v2748_v8 = vadd.f32 %v1491_v5, %v3821_v44  ;;  %v1493_v12 = vpop.f32.mrb[47].mxu0  ;;  %1768 = vmatmul.mubr.bf16.gmra.mrb[40].mxu1 %v1572_v61  ;;  %v1548_v14 = vmax.f32 %v2746_v1, 0.0 }
 0x286   : > { %v2749_v13 = vadd.f32 %v1493_v12, %v3825_v47  ;;  %v1549_v17 = vmax.f32 %v2747_v0, 0.0 }
 0x287   : > { %v1550_v15 = vmax.f32 %v2748_v8, 0.0 }
 0x288   : > { %v1551_v19 = vmax.f32 %v2749_v13, 0.0 }
 0x289   : > { %v1574_v20 = vpack.c.bf16 %v1550_v15, %v1548_v14  ;;  %v2997_v14 = vld [vmem:[%s4064_s7 + $0x18] sm:$0xff]   ;;  %v3000_v15 = vld [vmem:[%s4064_s7 + $0x30] sm:$0xff]  }
 0x28a   : > { %v1575_v21 = vpack.c.bf16 %v1551_v19, %v1549_v17  ;;  %v1497_v25 = vpop.f32.mrb[48].mxu0  ;;  %2684 = vmatprep.subr.bf16.mxu1 %v2997_v14  ;;  %v3001_v17 = vld [vmem:[%s4064_s7 + $0x38] sm:$0xff]   ;;  %v3002_v19 = vld [vmem:[%s4066_s9] sm:$0xff]  }
 0x28b   : > { %v2750_v28 = vadd.f32 %v1497_v25, %v3821_v44  ;;  %v1499_v2 = vpop.f32.mrb[49].mxu0  ;;  %2685 = vmatpush3.bf16.msra.mxu1 %v2997_v14 }
 0x28c   : > { %v2751_v4 = vadd.f32 %v1499_v2, %v3825_v47  ;;  %v1501_v22 = vpop.f32.mrb[50].mxu0  ;;  %1775 = vmatprep.mubr.bf16.mxu1 %v1575_v21  ;;  %v3883_v21 = vld [vmem:[#allocation7] ss:$0 sm:$0xff] }
 0x28d   : > { %v2752_v24 = vadd.f32 %v1501_v22, %v3821_v44  ;;  %v1503_v58 = vpop.f32.mrb[51].mxu0  ;;  %1776 = vmatmul.mubr.bf16.gmra.mrb[44].mxu1 %v1574_v20  ;;  %v1552_v37 = vmax.f32 %v2750_v28, 0.0 }
 0x28e   : > { %v2753_v60 = vadd.f32 %v1503_v58, %v3825_v47  ;;  %v1553_v16 = vmax.f32 %v2751_v4, 0.0 }
 0x28f   : > { %v1554_v39 = vmax.f32 %v2752_v24, 0.0 }
 0x290   : > { %v1555_v18 = vmax.f32 %v2753_v60, 0.0 }
 0x291   : > { %v1576_v23 = vpack.c.bf16 %v1554_v39, %v1552_v37 }
 0x292   : > { %v1577_v26 = vpack.c.bf16 %v1555_v18, %v1553_v16  ;;  %v1507_v7 = vpop.f32.mrb[52].mxu0 }
 0x293   : > { %v2754_v27 = vadd.f32 %v1507_v7, %v3821_v44  ;;  %v1509_v29 = vpop.f32.mrb[53].mxu0 }
 0x294   : > { %v2755_v6 = vadd.f32 %v1509_v29, %v3825_v47  ;;  %v1511_v9 = vpop.f32.mrb[54].mxu0  ;;  %1783 = vmatprep.mubr.bf16.mxu1 %v1577_v26 }
 0x295   : > { %v2756_v30 = vadd.f32 %v1511_v9, %v3821_v44  ;;  %v1513_v31 = vpop.f32.mrb[55].mxu0  ;;  %1784 = vmatmul.mubr.bf16.gmra.mrb[48].mxu1 %v1576_v23  ;;  %v1556_v33 = vmax.f32 %v2754_v27, 0.0 }
 0x296   : > { %v2757_v32 = vadd.f32 %v1513_v31, %v3825_v47  ;;  %v1557_v35 = vmax.f32 %v2755_v6, 0.0 }
 0x297   : > { %v1558_v34 = vmax.f32 %v2756_v30, 0.0 }
 0x298   : > { %v1559_v36 = vmax.f32 %v2757_v32, 0.0 }
 0x299   : > { %v1578_v38 = vpack.c.bf16 %v1558_v34, %v1556_v33 }
 0x29a   : > { %v1579_v40 = vpack.c.bf16 %v1559_v36, %v1557_v35  ;;  %v1517_v41 = vpop.f32.mrb[56].mxu0  ;;  %v3003_v36 = vld [vmem:[%s4066_s9 + $0x8] sm:$0xff]  }
 0x29b   : > { %v2758_v42 = vadd.f32 %v1517_v41, %v3821_v44  ;;  %v1519_v43 = vpop.f32.mrb[57].mxu0 }
 0x29c   : > { %v2759_v45 = vadd.f32 %v1519_v43, %v3825_v47  ;;  %v1521_v46 = vpop.f32.mrb[58].mxu0  ;;  %1791 = vmatprep.mubr.bf16.mxu1 %v1579_v40 }
 0x29d   : > { %v2760_v48 = vadd.f32 %v1521_v46, %v3821_v44  ;;  %v1523_v49 = vpop.f32.mrb[59].mxu0  ;;  %1792 = vmatmul.mubr.bf16.gmra.mrb[52].mxu1 %v1578_v38  ;;  %v1560_v51 = vmax.f32 %v2758_v42, 0.0 }
 0x29e   : > { %v2761_v50 = vadd.f32 %v1523_v49, %v3825_v47  ;;  %v1561_v52 = vmax.f32 %v2759_v45, 0.0 }
 0x29f   : > { %v1562_v10 = vmax.f32 %v2760_v48, 0.0 }
 0x2a0   : > { %v1563_v53 = vmax.f32 %v2761_v50, 0.0 }
 0x2a1   : > { %v1580_v54 = vpack.c.bf16 %v1562_v10, %v1560_v51 }
 0x2a2   : > { %v1581_v55 = vpack.c.bf16 %v1563_v53, %v1561_v52  ;;  %v1527_v56 = vpop.f32.mrb[60].mxu0 }
 0x2a3   : > { %v2762_v57 = vadd.f32 %v1527_v56, %v3821_v44  ;;  %v1529_v11 = vpop.f32.mrb[61].mxu0 }
 0x2a4   : > { %v2763_v59 = vadd.f32 %v1529_v11, %v3825_v47  ;;  %v1531_v61 = vpop.f32.mrb[62].mxu0  ;;  %1799 = vmatprep.mubr.bf16.mxu1 %v1581_v55 }
 0x2a5   : > { %v2764_v62 = vadd.f32 %v1531_v61, %v3821_v44  ;;  %v1533_v63 = vpop.f32.mrb[63].mxu0  ;;  %1800 = vmatmul.mubr.bf16.gmra.mrb[56].mxu1 %v1580_v54  ;;  %v1564_v3 = vmax.f32 %v2762_v57, 0.0  ;;  %v2998_v44 = vld [vmem:[%s4064_s7 + $0x20] sm:$0xff]  }
 0x2a6   : > { %v2765_v1 = vadd.f32 %v1533_v63, %v3825_v47  ;;  %v1565_v5 = vmax.f32 %v2763_v59, 0.0  ;;  %2686 = vmatprep.subr.bf16.mxu1 %v2998_v44  ;;  %v2999_v47 = vld [vmem:[%s4064_s7 + $0x28] sm:$0xff]  }
 0x2a7   : > { %v1566_v0 = vmax.f32 %v2764_v62, 0.0  ;;  %2687 = vmatpush3.bf16.msra.mxu1 %v2998_v44 }
 0x2a8   : > { %v1567_v8 = vmax.f32 %v2765_v1, 0.0  ;;  %2688 = vmatprep.subr.bf16.mxu1 %v2999_v47 }
 0x2a9   : > { %v1582_v12 = vpack.c.bf16 %v1566_v0, %v1564_v3 }
 0x2aa   : > { %v1583_v13 = vpack.c.bf16 %v1567_v8, %v1565_v5 }
 0x2ab   : > { %2689 = vmatpush3.bf16.msra.mxu1 %v2999_v47 }
 0x2ac   : > { %1807 = vmatprep.mubr.bf16.mxu1 %v1583_v13  ;;  %2690 = vmatprep.subr.bf16.mxu1 %v3000_v15 }
 0x2ad   : > { %1808 = vmatmul.mubr.bf16.gmra.mrb[60].mxu1 %v1582_v12 }
 0x2af   : > { %2691 = vmatpush3.bf16.msra.mxu1 %v3000_v15 }
 0x2b0   : > { %2692 = vmatprep.subr.bf16.mxu1 %v3001_v17 }
 0x2b3   : > { %2693 = vmatpush3.bf16.msra.mxu1 %v3001_v17 }
 0x2b4   : > { %2710 = vmatprep.subr.bf16.mxu1 %v3002_v19 }
 0x348   : > { %v2602_v20 = vpop.f32.mrb[32].mxu1 }
 0x349   : > { %v2603_v25 = vpop.f32.mrb[33].mxu1 }
 0x34a   : > { %v2604_v28 = vadd.f32 %v2603_v25, %v2602_v20  ;;  %v2605_v2 = vpop.f32.mrb[34].mxu1 }
 0x34b   : > { %v2606_v4 = vpop.f32.mrb[35].mxu1 }
 0x34c   : > { %v1754_v22 = vadd.f32 %v2604_v28, %v3883_v21  ;;  %v2607_v24 = vadd.f32 %v2606_v4, %v2605_v2 }
 0x34e   : > { %v1757_v58 = vadd.f32 %v2607_v24, %v3883_v21  ;;  %v1816_v60 = vmax.f32 %v1754_v22, 0.0 }
 0x350   : > { %v1817_v37 = vmax.f32 %v1757_v58, 0.0  ;;  %v2608_v39 = vpop.f32.mrb[36].mxu1 }
 0x351   : > { %v2609_v16 = vpop.f32.mrb[37].mxu1 }
 0x352   : > { %v2610_v18 = vadd.f32 %v2609_v16, %v2608_v39  ;;  %v2611_v23 = vpop.f32.mrb[38].mxu1  ;;  %v1832_v26 = vpack.c.bf16 %v1817_v37, %v1816_v60 }
 0x353   : > { %v2612_v7 = vpop.f32.mrb[39].mxu1 }
 0x354   : > { %v1762_v27 = vadd.f32 %v2610_v18, %v3883_v21  ;;  %v2613_v29 = vadd.f32 %v2612_v7, %v2611_v23  ;;  %2694 = vmatprep.mubr.bf16.mxu1 %v1832_v26 }
 0x356   : > { %v1765_v6 = vadd.f32 %v2613_v29, %v3883_v21  ;;  %v1818_v9 = vmax.f32 %v1762_v27, 0.0 }
 0x358   : > { %v1819_v30 = vmax.f32 %v1765_v6, 0.0  ;;  %v2614_v31 = vpop.f32.mrb[40].mxu1 }
 0x359   : > { %v2615_v32 = vpop.f32.mrb[41].mxu1 }
 0x35a   : > { %v1833_v33 = vpack.c.bf16 %v1819_v30, %v1818_v9  ;;  %v2616_v34 = vadd.f32 %v2615_v32, %v2614_v31  ;;  %v2617_v35 = vpop.f32.mrb[42].mxu1 }
 0x35b   : > { %v2618_v38 = vpop.f32.mrb[43].mxu1 }
 0x35c   : > { %v1770_v40 = vadd.f32 %v2616_v34, %v3883_v21  ;;  %v2619_v41 = vadd.f32 %v2618_v38, %v2617_v35  ;;  %2695 = vmatmul.mubr.bf16.vlgmr.msra.gmra.mrb[64].mxu1 %v1833_v33  ;;  %v3005_v38 = vld [vmem:[%s4066_s9 + $0x18] sm:$0xff]  }
 0x35d   : > { %2711 = vmatpush3.bf16.msra.mxu1 %v3002_v19 }
 0x35e   : > { %v1773_v42 = vadd.f32 %v2619_v41, %v3883_v21  ;;  %2712 = vmatprep.subr.bf16.mxu1 %v3003_v36  ;;  %v1820_v43 = vmax.f32 %v1770_v40, 0.0 }
 0x360   : > { %v1821_v45 = vmax.f32 %v1773_v42, 0.0  ;;  %v2620_v46 = vpop.f32.mrb[44].mxu1 }
 0x361   : > { %v2621_v48 = vpop.f32.mrb[45].mxu1  ;;  %2713 = vmatpush3.bf16.msra.mxu1 %v3003_v36  ;;  %v3004_v36 = vld [vmem:[%s4066_s9 + $0x10] sm:$0xff]  }
 0x362   : > { %v2622_v49 = vadd.f32 %v2621_v48, %v2620_v46  ;;  %v2623_v50 = vpop.f32.mrb[46].mxu1  ;;  %v1834_v51 = vpack.c.bf16 %v1821_v45, %v1820_v43  ;;  %2714 = vmatprep.subr.bf16.mxu1 %v3004_v36 }
 0x363   : > { %v2624_v10 = vpop.f32.mrb[47].mxu1 }
 0x364   : > { %v1778_v52 = vadd.f32 %v2622_v49, %v3883_v21  ;;  %v2625_v53 = vadd.f32 %v2624_v10, %v2623_v50  ;;  %2698 = vmatprep.mubr.bf16.mxu1 %v1834_v51 }
 0x365   : > { %2715 = vmatpush3.bf16.msra.mxu1 %v3004_v36 }
 0x366   : > { %v1781_v54 = vadd.f32 %v2625_v53, %v3883_v21  ;;  %v1822_v55 = vmax.f32 %v1778_v52, 0.0  ;;  %2716 = vmatprep.subr.bf16.mxu1 %v3005_v38 }
 0x368   : > { %v1823_v56 = vmax.f32 %v1781_v54, 0.0  ;;  %v2626_v57 = vpop.f32.mrb[48].mxu1 }
 0x369   : > { %v2627_v11 = vpop.f32.mrb[49].mxu1  ;;  %2717 = vmatpush3.bf16.msra.mxu1 %v3005_v38 }
 0x36a   : > { %v2628_v59 = vadd.f32 %v2627_v11, %v2626_v57  ;;  %v2629_v61 = vpop.f32.mrb[50].mxu1  ;;  %v1835_v62 = vpack.c.bf16 %v1823_v56, %v1822_v55 }
 0x36b   : > { %v2630_v63 = vpop.f32.mrb[51].mxu1 }
 0x36c   : > { %v1786_v1 = vadd.f32 %v2628_v59, %v3883_v21  ;;  %v2631_v3 = vadd.f32 %v2630_v63, %v2629_v61  ;;  %2699 = vmatmul.mubr.bf16.gmra.mrb[68].mxu1 %v1835_v62 }
 0x36e   : > { %v1789_v0 = vadd.f32 %v2631_v3, %v3883_v21  ;;  %v1824_v5 = vmax.f32 %v1786_v1, 0.0 }
 0x370   : > { %v1825_v8 = vmax.f32 %v1789_v0, 0.0  ;;  %v2632_v12 = vpop.f32.mrb[52].mxu1 }
 0x371   : > { %v2633_v13 = vpop.f32.mrb[53].mxu1 }
 0x372   : > { %v2634_v14 = vadd.f32 %v2633_v13, %v2632_v12  ;;  %v2635_v44 = vpop.f32.mrb[54].mxu1  ;;  %v1836_v47 = vpack.c.bf16 %v1825_v8, %v1824_v5 }
 0x373   : > { %v2636_v15 = vpop.f32.mrb[55].mxu1 }
 0x374   : > { %v1794_v17 = vadd.f32 %v2634_v14, %v3883_v21  ;;  %v2637_v19 = vadd.f32 %v2636_v15, %v2635_v44  ;;  %2702 = vmatprep.mubr.bf16.mxu1 %v1836_v47 }
 0x376   : > { %v1797_v20 = vadd.f32 %v2637_v19, %v3883_v21  ;;  %v1826_v25 = vmax.f32 %v1794_v17, 0.0 }
 0x378   : > { %v1827_v28 = vmax.f32 %v1797_v20, 0.0  ;;  %v2638_v2 = vpop.f32.mrb[56].mxu1 }
 0x379   : > { %v2639_v4 = vpop.f32.mrb[57].mxu1 }
 0x37a   : > { %v2640_v22 = vadd.f32 %v2639_v4, %v2638_v2  ;;  %v2641_v24 = vpop.f32.mrb[58].mxu1  ;;  %v1837_v58 = vpack.c.bf16 %v1827_v28, %v1826_v25 }
 0x37b   : > { %v2642_v60 = vpop.f32.mrb[59].mxu1 }
 0x37c   : > { %v1802_v37 = vadd.f32 %v2640_v22, %v3883_v21  ;;  %v2643_v39 = vadd.f32 %v2642_v60, %v2641_v24  ;;  %2703 = vmatmul.mubr.bf16.gmra.mrb[72].mxu1 %v1837_v58 }
 0x37e   : > { %v1805_v16 = vadd.f32 %v2643_v39, %v3883_v21  ;;  %v1828_v18 = vmax.f32 %v1802_v37, 0.0 }
 0x380   : > { %v1829_v23 = vmax.f32 %v1805_v16, 0.0  ;;  %v2644_v26 = vpop.f32.mrb[60].mxu1 }
 0x381   : > { %v2645_v7 = vpop.f32.mrb[61].mxu1 }
 0x382   : > { %v2646_v27 = vadd.f32 %v2645_v7, %v2644_v26  ;;  %v2647_v29 = vpop.f32.mrb[62].mxu1  ;;  %v1838_v6 = vpack.c.bf16 %v1829_v23, %v1828_v18 }
 0x383   : > { %v2648_v9 = vpop.f32.mrb[63].mxu1 }
 0x384   : > { %v1810_v30 = vadd.f32 %v2646_v27, %v3883_v21  ;;  %v2649_v31 = vadd.f32 %v2648_v9, %v2647_v29  ;;  %2706 = vmatprep.mubr.bf16.mxu1 %v1838_v6 }
 0x386   : > { %v1813_v32 = vadd.f32 %v2649_v31, %v3883_v21  ;;  %v1830_v33 = vmax.f32 %v1810_v30, 0.0  ;;  %v2556_v21 = vld [vmem:[%s4065_s8] ss:$0 sm:$0xff] }
 0x387   : > { %v3924_v31 = vld [vmem:[%s4067_s10] ss:$0 sm:$0xff] }
 0x388   : > { %v1831_v34 = vmax.f32 %v1813_v32, 0.0 }
 0x38a   : > { %v1839_v35 = vpack.c.bf16 %v1831_v34, %v1830_v33 }
 0x38c   : > { %2707 = vmatmul.mubr.bf16.gmra.mrb[76].mxu1 %v1839_v35 }
 0x42f   : > { %v2696_v40 = vpop.f32.mrb[64].mxu1 }
 0x430   : > { %v1954_v41 = vadd.f32 %v2696_v40, %v2556_v21  ;;  %v1945_v42 = vpop.f32.mrb[65].mxu1 }
 0x431   : > { %v1946_v43 = vadd.f32 %v2556_v21, %v1945_v42  ;;  %v2697_v45 = vpop.f32.mrb[66].mxu1 }
 0x432   : > { %v1957_v46 = vadd.f32 %v2697_v45, %v2556_v21  ;;  %v1948_v48 = vpop.f32.mrb[67].mxu1  ;;  %v2010_v50 = vmax.f32 %v1954_v41, 0.0 }
 0x433   : > { %v1949_v49 = vadd.f32 %v2556_v21, %v1948_v48  ;;  %v2008_v10 = vmax.f32 %v1946_v43, 0.0 }
 0x434   : > { %v2011_v51 = vmax.f32 %v1957_v46, 0.0 }
 0x435   : > { %v2009_v52 = vmax.f32 %v1949_v49, 0.0 }
 0x436   : > { %v2025_v53 = vpack.c.bf16 %v2011_v51, %v2010_v50 }
 0x437   : > { %v2024_v54 = vpack.c.bf16 %v2009_v52, %v2008_v10 }
 0x439   : > { %2718 = vmatprep.mubr.msk.bf16.mxu1 %vm2071_vm3, %v2024_v54 }
 0x43a   : > { %2719 = vmatmul.mubr.msk.bf16.vlgmr.msra.gmra.mrb[80].mxu1 %vm2071_vm3, %v2025_v53 }
 0x43f   : > { %v2700_v55 = vpop.f32.mrb[68].mxu1 }
 0x440   : > { %v1970_v56 = vadd.f32 %v2700_v55, %v2556_v21  ;;  %v1961_v57 = vpop.f32.mrb[69].mxu1 }
 0x441   : > { %v1962_v11 = vadd.f32 %v2556_v21, %v1961_v57  ;;  %v2701_v59 = vpop.f32.mrb[70].mxu1 }
 0x442   : > { %v1973_v61 = vadd.f32 %v2701_v59, %v2556_v21  ;;  %v1964_v62 = vpop.f32.mrb[71].mxu1  ;;  %v2014_v1 = vmax.f32 %v1970_v56, 0.0 }
 0x443   : > { %v1965_v63 = vadd.f32 %v2556_v21, %v1964_v62  ;;  %v2012_v0 = vmax.f32 %v1962_v11, 0.0 }
 0x444   : > { %v2015_v3 = vmax.f32 %v1973_v61, 0.0 }
 0x445   : > { %v2013_v5 = vmax.f32 %v1965_v63, 0.0 }
 0x446   : > { %v2027_v8 = vpack.c.bf16 %v2015_v3, %v2014_v1 }
 0x447   : > { %v2026_v12 = vpack.c.bf16 %v2013_v5, %v2012_v0 }
 0x449   : > { %2722 = vmatprep.mubr.msk.bf16.mxu1 %vm2071_vm3, %v2026_v12 }
 0x44a   : > { %2723 = vmatmul.mubr.msk.bf16.gmra.mrb[84].mxu1 %vm2071_vm3, %v2027_v8 }
 0x44f   : > { %v2704_v13 = vpop.f32.mrb[72].mxu1 }
 0x450   : > { %v1986_v14 = vadd.f32 %v2704_v13, %v2556_v21  ;;  %v1977_v44 = vpop.f32.mrb[73].mxu1 }
 0x451   : > { %v1978_v47 = vadd.f32 %v2556_v21, %v1977_v44  ;;  %v2705_v15 = vpop.f32.mrb[74].mxu1 }
 0x452   : > { %v1989_v17 = vadd.f32 %v2705_v15, %v2556_v21  ;;  %v1980_v19 = vpop.f32.mrb[75].mxu1  ;;  %v2018_v25 = vmax.f32 %v1986_v14, 0.0 }
 0x453   : > { %v1981_v20 = vadd.f32 %v2556_v21, %v1980_v19  ;;  %v2016_v2 = vmax.f32 %v1978_v47, 0.0 }
 0x454   : > { %v2019_v28 = vmax.f32 %v1989_v17, 0.0  ;;  %v3938_v17 = vld [vmem:[%s4068_s11] ss:$0 sm:$0xff] }
 0x455   : > { %v2017_v4 = vmax.f32 %v1981_v20, 0.0  ;;  %v3945_v20 = vld [vmem:[%s4069_s12] ss:$0 sm:$0xff] }
 0x456   : > { %v2029_v22 = vpack.c.bf16 %v2019_v28, %v2018_v25 }
 0x457   : > { %v2028_v24 = vpack.c.bf16 %v2017_v4, %v2016_v2 }
 0x459   : > { %2726 = vmatprep.mubr.msk.bf16.mxu1 %vm2071_vm3, %v2028_v24 }
 0x45a   : > { %2727 = vmatmul.mubr.msk.bf16.gmra.mrb[88].mxu1 %vm2071_vm3, %v2029_v22 }
 0x45f   : > { %v2708_v58 = vpop.f32.mrb[76].mxu1 }
 0x460   : > { %v2002_v60 = vadd.f32 %v2708_v58, %v2556_v21  ;;  %v1993_v37 = vpop.f32.mrb[77].mxu1 }
 0x461   : > { %v1994_v39 = vadd.f32 %v2556_v21, %v1993_v37  ;;  %v2709_v16 = vpop.f32.mrb[78].mxu1 }
 0x462   : > { %v2005_v18 = vadd.f32 %v2709_v16, %v2556_v21  ;;  %v1996_v23 = vpop.f32.mrb[79].mxu1  ;;  %v2022_v7 = vmax.f32 %v2002_v60, 0.0 }
 0x463   : > { %v1997_v26 = vadd.f32 %v2556_v21, %v1996_v23  ;;  %v2020_v29 = vmax.f32 %v1994_v39, 0.0 }
 0x464   : > { %v2023_v27 = vmax.f32 %v2005_v18, 0.0 }
 0x465   : > { %v2021_v6 = vmax.f32 %v1997_v26, 0.0 }
 0x466   : > { %v2031_v9 = vpack.c.bf16 %v2023_v27, %v2022_v7 }
 0x467   : > { %v2030_v30 = vpack.c.bf16 %v2021_v6, %v2020_v29 }
 0x469   : > { %2730 = vmatprep.mubr.msk.bf16.mxu1 %vm2071_vm3, %v2030_v30 }
 0x46a   : > { %2731 = vmatmul.mubr.msk.bf16.gmra.mrb[92].mxu1 %vm2071_vm3, %v2031_v9 }
 0x50d   : > { %v2720_v32 = vpop.f32.mrb[80].mxu1 }
 0x50e   : > { %v2139_v33 = vadd.f32 %v2720_v32, %v3924_v31  ;;  %v2130_v34 = vpop.f32.mrb[81].mxu1 }
 0x50f   : > { %v2131_v35 = vadd.f32 %v3924_v31, %v2130_v34  ;;  %v2721_v36 = vpop.f32.mrb[82].mxu1 }
 0x510   : > { %v2195_v38 = vsub.f32 0.0, %v2139_v33  ;;  %v2142_v21 = vadd.f32 %v2721_v36, %v3924_v31  ;;  %v2133_v40 = vpop.f32.mrb[83].mxu1 }
 0x511   : > { %v2193_v41 = vsub.f32 0.0, %v2131_v35  ;;  %v2134_v42 = vadd.f32 %v3924_v31, %v2133_v40 }
 0x512   : > { %v2213_v43 = vmul.f32 1.442695, %v2195_v38  ;;  %v2196_v45 = vsub.f32 0.0, %v2142_v21 }
 0x513   : > { %v2209_v46 = vmul.f32 1.442695, %v2193_v41  ;;  %v2194_v48 = vsub.f32 0.0, %v2134_v42 }
 0x514   : > { %3006 = vpow2.f32 %v2213_v43  ;;  %v2215_v49 = vmul.f32 1.442695, %v2196_v45 }
 0x515   : > { %3008 = vpow2.f32 %v2209_v46  ;;  %v2211_v50 = vmul.f32 1.442695, %v2194_v48 }
 0x516   : > { %3010 = vpow2.f32 %v2215_v49 }
 0x517   : > { %3012 = vpow2.f32 %v2211_v50 }
 0x51d   : > { %v2724_v51 = vpop.f32.mrb[84].mxu1 }
 0x51e   : > { %v3007_v10 = vpop.eup %3006  ;;  %v2155_v52 = vadd.f32 %v2724_v51, %v3924_v31  ;;  %v2146_v53 = vpop.f32.mrb[85].mxu1 }
 0x51f   : > { %v3009_v54 = vpop.eup %3008  ;;  %v2243_v55 = vadd.f32 1.0, %v3007_v10  ;;  %v2147_v56 = vadd.f32 %v3924_v31, %v2146_v53  ;;  %v2725_v57 = vpop.f32.mrb[86].mxu1 }
 0x520   : > { %v3011_v11 = vpop.eup %3010  ;;  %v2241_v59 = vadd.f32 1.0, %v3009_v54  ;;  %v2199_v61 = vsub.f32 0.0, %v2155_v52  ;;  %v2158_v62 = vadd.f32 %v2725_v57, %v3924_v31  ;;  %v2149_v63 = vpop.f32.mrb[87].mxu1 }
 0x521   : > { %v3013_v1 = vpop.eup %3012  ;;  %3014 = vrcp.f32 %v2243_v55  ;;  %v2244_v3 = vadd.f32 1.0, %v3011_v11  ;;  %v2197_v0 = vsub.f32 0.0, %v2147_v56  ;;  %v2150_v5 = vadd.f32 %v3924_v31, %v2149_v63 }
 0x522   : > { %3016 = vrcp.f32 %v2241_v59  ;;  %v2242_v8 = vadd.f32 1.0, %v3013_v1  ;;  %v2221_v12 = vmul.f32 1.442695, %v2199_v61  ;;  %v2200_v13 = vsub.f32 0.0, %v2158_v62 }
 0x523   : > { %3018 = vrcp.f32 %v2244_v3  ;;  %v2217_v14 = vmul.f32 1.442695, %v2197_v0  ;;  %v2198_v44 = vsub.f32 0.0, %v2150_v5 }
 0x524   : > { %3020 = vrcp.f32 %v2242_v8  ;;  %v2223_v47 = vmul.f32 1.442695, %v2200_v13 }
 0x525   : > { %3022 = vpow2.f32 %v2221_v12  ;;  %v2219_v15 = vmul.f32 1.442695, %v2198_v44 }
 0x526   : > { %3024 = vpow2.f32 %v2217_v14 }
 0x527   : > { %3026 = vpow2.f32 %v2223_v47 }
 0x528   : > { %3028 = vpow2.f32 %v2219_v15 }
 0x52b   : > { %v3015_v19 = vpop.eup %3014 }
 0x52c   : > { %v3017_v25 = vpop.eup %3016  ;;  %v2282_v28 = vmul.f32 %v3015_v19, %v3938_v17 }
 0x52d   : > { %v3019_v2 = vpop.eup %3018  ;;  %v2280_v4 = vmul.f32 %v3017_v25, %v3938_v17  ;;  %v2728_v22 = vpop.f32.mrb[88].mxu1 }
 0x52e   : > { %v3021_v24 = vpop.eup %3020  ;;  %v2305_v58 = vadd.f32 %v3945_v20, %v2282_v28  ;;  %v2283_v60 = vmul.f32 %v3019_v2, %v3938_v17  ;;  %v2171_v37 = vadd.f32 %v2728_v22, %v3924_v31  ;;  %v2162_v39 = vpop.f32.mrb[89].mxu1 }
 0x52f   : > { %v3023_v16 = vpop.eup %3022  ;;  %v2303_v18 = vadd.f32 %v3945_v20, %v2280_v4  ;;  %v2281_v23 = vmul.f32 %v3021_v24, %v3938_v17  ;;  %v2163_v26 = vadd.f32 %v3924_v31, %v2162_v39  ;;  %v2729_v7 = vpop.f32.mrb[90].mxu1 }
 0x530   : > { %v3025_v27 = vpop.eup %3024  ;;  %2321 = vst [vmem:[%s3955_s21 + $0x10] sm:$0xff] %v2305_v58  ;;  %v2306_v29 = vadd.f32 %v3945_v20, %v2283_v60  ;;  %v2247_v6 = vadd.f32 1.0, %v3023_v16  ;;  %v2203_v9 = vsub.f32 0.0, %v2171_v37  ;;  %v2174_v30 = vadd.f32 %v2729_v7, %v3924_v31  ;;  %v2165_v32 = vpop.f32.mrb[91].mxu1 }
 0x531   : > { %v3027_v33 = vpop.eup %3026  ;;  %2319 = vst [vmem:[%s3955_s21] sm:$0xff] %v2303_v18  ;;  %v2304_v34 = vadd.f32 %v3945_v20, %v2281_v23  ;;  %v2245_v35 = vadd.f32 1.0, %v3025_v27  ;;  %v2201_v36 = vsub.f32 0.0, %v2163_v26  ;;  %v2166_v38 = vadd.f32 %v3924_v31, %v2165_v32 }
 0x532   : > { %v3029_v21 = vpop.eup %3028  ;;  %2322 = vst [vmem:[%s3955_s21 + $0x18] sm:$0xff] %v2306_v29  ;;  %3030 = vrcp.f32 %v2247_v6  ;;  %v2248_v40 = vadd.f32 1.0, %v3027_v33  ;;  %v2229_v41 = vmul.f32 1.442695, %v2203_v9  ;;  %v2204_v42 = vsub.f32 0.0, %v2174_v30 }
 0x533   : > { %2320 = vst [vmem:[%s3955_s21 + $0x8] sm:$0xff] %v2304_v34  ;;  %3032 = vrcp.f32 %v2245_v35  ;;  %v2246_v43 = vadd.f32 1.0, %v3029_v21  ;;  %v2225_v45 = vmul.f32 1.442695, %v2201_v36  ;;  %v2202_v46 = vsub.f32 0.0, %v2166_v38 }
 0x534   : > { %3034 = vrcp.f32 %v2248_v40  ;;  %v2231_v48 = vmul.f32 1.442695, %v2204_v42 }
 0x535   : > { %3036 = vrcp.f32 %v2246_v43  ;;  %v2227_v49 = vmul.f32 1.442695, %v2202_v46 }
 0x536   : > { %3038 = vpow2.f32 %v2229_v41 }
 0x537   : > { %3040 = vpow2.f32 %v2225_v45 }
 0x538   : > { %3042 = vpow2.f32 %v2231_v48 }
 0x539   : > { %3044 = vpow2.f32 %v2227_v49 }
 0x53c   : > { %v3031_v50 = vpop.eup %3030 }
 0x53d   : > { %v3033_v51 = vpop.eup %3032  ;;  %v2286_v10 = vmul.f32 %v3031_v50, %v3938_v17  ;;  %v2732_v52 = vpop.f32.mrb[92].mxu1 }
 0x53e   : > { %v3035_v53 = vpop.eup %3034  ;;  %v2284_v54 = vmul.f32 %v3033_v51, %v3938_v17  ;;  %v2187_v55 = vadd.f32 %v2732_v52, %v3924_v31  ;;  %v2178_v56 = vpop.f32.mrb[93].mxu1 }
 0x53f   : > { %v3037_v57 = vpop.eup %3036  ;;  %v2309_v11 = vadd.f32 %v3945_v20, %v2286_v10  ;;  %v2287_v59 = vmul.f32 %v3035_v53, %v3938_v17  ;;  %v2179_v61 = vadd.f32 %v3924_v31, %v2178_v56  ;;  %v2733_v62 = vpop.f32.mrb[94].mxu1 }
 0x540   : > { %v3039_v63 = vpop.eup %3038  ;;  %v2307_v1 = vadd.f32 %v3945_v20, %v2284_v54  ;;  %v2285_v3 = vmul.f32 %v3037_v57, %v3938_v17  ;;  %v2207_v0 = vsub.f32 0.0, %v2187_v55  ;;  %v2190_v5 = vadd.f32 %v2733_v62, %v3924_v31  ;;  %v2181_v8 = vpop.f32.mrb[95].mxu1 }
 0x541   : > { %v3041_v12 = vpop.eup %3040  ;;  %2325 = vst [vmem:[%s3955_s21 + $0x30] sm:$0xff] %v2309_v11  ;;  %v2310_v13 = vadd.f32 %v3945_v20, %v2287_v59  ;;  %v2251_v14 = vadd.f32 1.0, %v3039_v63  ;;  %v2205_v44 = vsub.f32 0.0, %v2179_v61  ;;  %v2182_v47 = vadd.f32 %v3924_v31, %v2181_v8 }
 0x542   : > { %v3043_v15 = vpop.eup %3042  ;;  %2323 = vst [vmem:[%s3955_s21 + $0x20] sm:$0xff] %v2307_v1  ;;  %v2308_v19 = vadd.f32 %v3945_v20, %v2285_v3  ;;  %v2249_v25 = vadd.f32 1.0, %v3041_v12  ;;  %v2208_v28 = vsub.f32 0.0, %v2190_v5  ;;  %v2237_v22 = vmul.f32 1.442695, %v2207_v0 }
 0x543   : > { %v3045_v2 = vpop.eup %3044  ;;  %2326 = vst [vmem:[%s3955_s21 + $0x38] sm:$0xff] %v2310_v13  ;;  %3046 = vrcp.f32 %v2251_v14  ;;  %v2252_v4 = vadd.f32 1.0, %v3043_v15  ;;  %v2206_v24 = vsub.f32 0.0, %v2182_v47  ;;  %v2233_v60 = vmul.f32 1.442695, %v2205_v44 }
 0x544   : > { %2324 = vst [vmem:[%s3955_s21 + $0x28] sm:$0xff] %v2308_v19  ;;  %3048 = vrcp.f32 %v2249_v25  ;;  %v2250_v58 = vadd.f32 1.0, %v3045_v2  ;;  %v2239_v37 = vmul.f32 1.442695, %v2208_v28 }
 0x545   : > { %3050 = vrcp.f32 %v2252_v4  ;;  %v2235_v31 = vmul.f32 1.442695, %v2206_v24 }
 0x546   : > { %3052 = vrcp.f32 %v2250_v58 }
 0x547   : > { %3054 = vpow2.f32 %v2237_v22 }
 0x548   : > { %3056 = vpow2.f32 %v2233_v60 }
 0x549   : > { %3058 = vpow2.f32 %v2239_v37 }
 0x54a   : > { %3060 = vpow2.f32 %v2235_v31 }
 0x54d   : > { %v3047_v39 = vpop.eup %3046 }
 0x54e   : > { %v3049_v16 = vpop.eup %3048  ;;  %v2290_v18 = vmul.f32 %v3047_v39, %v3938_v17 }
 0x54f   : > { %v3051_v23 = vpop.eup %3050  ;;  %v2288_v26 = vmul.f32 %v3049_v16, %v3938_v17 }
 0x550   : > { %v3053_v7 = vpop.eup %3052  ;;  %v2313_v27 = vadd.f32 %v3945_v20, %v2290_v18  ;;  %v2291_v29 = vmul.f32 %v3051_v23, %v3938_v17 }
 0x551   : > { %v3055_v6 = vpop.eup %3054  ;;  %v2311_v9 = vadd.f32 %v3945_v20, %v2288_v26  ;;  %v2289_v30 = vmul.f32 %v3053_v7, %v3938_v17 }
 0x552   : > { %v3057_v32 = vpop.eup %3056  ;;  %2329 = vst [vmem:[%s3955_s21 + $0x50] sm:$0xff] %v2313_v27  ;;  %v2314_v33 = vadd.f32 %v3945_v20, %v2291_v29  ;;  %v2255_v34 = vadd.f32 1.0, %v3055_v6 }
 0x553   : > { %v3059_v35 = vpop.eup %3058  ;;  %2327 = vst [vmem:[%s3955_s21 + $0x40] sm:$0xff] %v2311_v9  ;;  %v2312_v36 = vadd.f32 %v3945_v20, %v2289_v30  ;;  %v2253_v38 = vadd.f32 1.0, %v3057_v32 }
 0x554   : > { %v3061_v21 = vpop.eup %3060  ;;  %2330 = vst [vmem:[%s3955_s21 + $0x58] sm:$0xff] %v2314_v33  ;;  %3062 = vrcp.f32 %v2255_v34  ;;  %v2256_v40 = vadd.f32 1.0, %v3059_v35 }
 0x555   : > { %2328 = vst [vmem:[%s3955_s21 + $0x48] sm:$0xff] %v2312_v36  ;;  %3064 = vrcp.f32 %v2253_v38  ;;  %v2254_v41 = vadd.f32 1.0, %v3061_v21 }
 0x556   : > { %3066 = vrcp.f32 %v2256_v40 }
 0x557   : > { %3068 = vrcp.f32 %v2254_v41 }
 0x55e   : > { %v3063_v42 = vpop.eup %3062 }
 0x55f   : > { %v3065_v43 = vpop.eup %3064  ;;  %v2294_v45 = vmul.f32 %v3063_v42, %v3938_v17 }
 0x560   : > { %v3067_v46 = vpop.eup %3066  ;;  %v2292_v48 = vmul.f32 %v3065_v43, %v3938_v17 }
 0x561   : > { %v3069_v49 = vpop.eup %3068  ;;  %v2317_v50 = vadd.f32 %v3945_v20, %v2294_v45  ;;  %v2295_v51 = vmul.f32 %v3067_v46, %v3938_v17 }
 0x562   : > { %v2315_v10 = vadd.f32 %v3945_v20, %v2292_v48  ;;  %v2293_v52 = vmul.f32 %v3069_v49, %v3938_v17 }
 0x563   : > { %2333 = vst [vmem:[%s3955_s21 + $0x70] sm:$0xff] %v2317_v50  ;;  %v2318_v53 = vadd.f32 %v3945_v20, %v2295_v51 }
 0x564   : > { %2331 = vst [vmem:[%s3955_s21 + $0x60] sm:$0xff] %v2315_v10  ;;  %v2316_v54 = vadd.f32 %v3945_v20, %v2293_v52 }
 0x565   : > { %2334 = vst [vmem:[%s3955_s21 + $0x78] sm:$0xff] %v2318_v53 }
 0x566   : > { %2332 = vst [vmem:[%s3955_s21 + $0x68] sm:$0xff] %v2316_v54 }
 0x567   : > { %3167 = shalt.err (!%p3164_p11)
}
 0x568   : > { %s3168_s13 = scalar_lea.hbm %s4006_s18, 2048  ;;  %s3172_s20 = scalar_lea.hbm %s4104_s24, 6144 }
 0x569   : > { %p3169_p13 = scmp.ne.s32.totalorder %s4006_s18, %s3168_s13  ;;  %p3173_p6 = scmp.lt.u32.totalorder %s4006_s18, %s4104_s24 }
 0x56a   : > { %p3174_p9 = scmp.lt.u32.totalorder %s3172_s20, %s3168_s13  ;;  %p3176_p10 = scmp.lt.u32.totalorder %s3168_s13, %s4006_s18 }
 0x56b   : > { %p3170_p5 = pnand %p3169_p13, %p4105_p1 }
 0x56c   : > { %p3175_p12 = por %p3174_p9, %p3173_p6 }
 0x56d   : > { %p3171_p0 = pneg %p3170_p5 }
 0x56e   : > { %p3177_p2 = por %p3176_p10, %p3175_p12 }
 0x570   : > { %p3178_p3 = pnand %p3177_p2, %p3171_p0 }
 0x572   : > { %3181 = shalt.err (!%p3178_p3)
}
 0x573   : > { %s3236_s27 = smov 128   ;;  %s3237_s17 = smov 8  }
 0x574   : > { %2810 = dma.vmem_to_hbm [thread:$0]  (%p4105_p1), %s4008_s14, 2048, %s4006_s18, %s4016_s29, %s3236_s27, %s3236_s27, %s3237_s17  }
 0x575 PF: > { %s4106_s16 = sld [smem:[#allocation14_spill]]  ;;  %s4107_s15 = sld [smem:[#allocation12_spill]] }
 0x576   : > { %s4108_s22 = sld [smem:[#allocation18_spill]] }
 0x57b   : > { %p2832_p4 = scmp.ge.s32.totalorder %s4106_s16, 2  ;;  %s2364_s30 = sand.u32 1, %s4107_s15  }
 0x57c   : > { %p4109_p7 = scmp.ne.s32.totalorder %s4108_s22, 0  ;;  %s2365_s25 = scalar_lea.sflag [#allocation4], %s2364_s30 }
 0x57e   : > { %p2823_p8 = pnand %p2832_p4, %p4109_p7 }
 0x580   : > { %3207 = dma.done.wait (!%p2823_p8), %s2365_s25, 2048  }
 0x581   : > { %3209 = vsyncadd (!%p2823_p8), %s2365_s25, 4294965248  ;;  %s4110_s28 = sld [smem:[#allocation15_spill]]  ;;  %s4111_s13 = sld [smem:[#allocation13_spill]] }
 0x582   : > { %s4112_s27 = sld [smem:[#allocation16_spill]]  ;;  %s4113_s25 = smov %s3216_s26 }
 0x587   : > { %p25_p11 = scmp.ge.s32.totalorder %s4110_s28, 5   ;;  %s4114_s26 = smov %s4111_s13 }
 0x589   :  { %27 = sbr.rel (!%p25_p11) target bundleno = 8 (0x8), region = 120 }
 0x590   :  { %2370 = vsyncpa [#allocation3], 1 }
 0x591   :  { %2372 = vsyncpa [#allocation3 + $0x1], 1 }
 0x592   :  { %2373 = vsyncpa [#allocation6], 1 }
 0x593   :  { %2374 = vsyncpa [#allocation4], 1 }
 0x594   :  { %2376 = vsyncpa [#allocation4 + $0x1], 1 }

</bundles_post_ra>
